<compile_context>
chip_gen: v7x
topology: tpu7x:2x2x1
jax: 0.10.0
libtpu: 0.0.40
codegen_flags: <defaults>
</compile_context>

<pallas_src>
import functools

import jax
import jax.numpy as jnp
from jax.experimental import pallas as pl
from jax.experimental.pallas import tpu as pltpu


def _round_up(n, m):
    return (n + m - 1) // m * m


def _pick_tk(K):
    """Largest 128-aligned tile that divides K; otherwise a full-K block."""
    for tk in (512, 384, 256, 128):
        if K % tk == 0:
            return tk
    return K  # full-K block (block dim == full array dim is always allowed)


# --------------------------- Pallas kernels ---------------------------------

def _gemm_kernel(x_ref, w_ref, b_ref, o_ref, acc_ref, *, relu):
    """Tiled GEMM: bf16 operands, f32 VMEM scratch accumulator, bf16 output.

    grid = (M-tiles, N-tiles, K-tiles), K innermost; the output block index is
    constant over K so o_ref stays resident and is written once, in the
    epilogue, already cast to bf16."""
    k = pl.program_id(2)

    @pl.when(k == 0)
    def _():
        acc_ref[...] = jnp.zeros_like(acc_ref)

    acc_ref[...] += jnp.dot(x_ref[...], w_ref[...],
                            preferred_element_type=jnp.float32)

    @pl.when(k == pl.num_programs(2) - 1)
    def _():
        out = acc_ref[...] + b_ref[...]
        if relu:
            out = jnp.maximum(out, 0.0)
        o_ref[...] = out.astype(o_ref.dtype)


def _gemm_res_kernel(x_ref, w_ref, b_ref, r_ref, o_ref, acc_ref, *, relu):
    """Same as _gemm_kernel plus a fused residual add (bf16 residual, promoted
    to f32 only inside the epilogue)."""
    k = pl.program_id(2)

    @pl.when(k == 0)
    def _():
        acc_ref[...] = jnp.zeros_like(acc_ref)

    acc_ref[...] += jnp.dot(x_ref[...], w_ref[...],
                            preferred_element_type=jnp.float32)

    @pl.when(k == pl.num_programs(2) - 1)
    def _():
        out = acc_ref[...] + b_ref[...] + r_ref[...].astype(jnp.float32)
        if relu:
            out = jnp.maximum(out, 0.0)
        o_ref[...] = out.astype(o_ref.dtype)


def _conv3x3_taps(x_ref, w_ref, *, wp, m):
    """Accumulate the 9 taps of a stride-1 3x3 conv on a flattened padded frame.

    x_ref: (1, Lp, Cin) bf16 flattened padded frame; tap (di, dj) is the
    contiguous row window starting at di*wp + dj -- no reshape, no im2col."""
    cout = w_ref.shape[2]
    acc = jnp.zeros((m, cout), jnp.float32)
    for di in range(3):
        for dj in range(3):
            off = di * wp + dj
            tap = x_ref[0, off:off + m, :]                     # (m, Cin) bf16
            acc = acc + jnp.dot(tap, w_ref[di * 3 + dj],
                                preferred_element_type=jnp.float32)
    return acc


def _conv3x3_kernel(x_ref, w_ref, b_ref, o_ref, *, relu, wp, m):
    acc = _conv3x3_taps(x_ref, w_ref, wp=wp, m=m)
    out = acc + b_ref[...]
    if relu:
        out = jnp.maximum(out, 0.0)
    o_ref[0] = out.astype(o_ref.dtype)


def _conv3x3_res_kernel(x_ref, w_ref, b_ref, r_ref, o_ref, *, relu, wp, m):
    acc = _conv3x3_taps(x_ref, w_ref, wp=wp, m=m)
    out = acc + b_ref[...] + r_ref[0].astype(jnp.float32)
    if relu:
        out = jnp.maximum(out, 0.0)
    o_ref[0] = out.astype(o_ref.dtype)


def _head_kernel(x_ref, w_ref, b_ref, o_ref):
    # x: (B, T*Ho*Wo, F) bf16 — fused global-average-pool + temporal mean, then fc.
    feat = jnp.mean(x_ref[...].astype(jnp.float32), axis=1)          # (B, F)
    logits = jnp.dot(feat.astype(jnp.bfloat16), w_ref[...],
                     preferred_element_type=jnp.float32) + b_ref[...]
    o_ref[...] = logits.astype(o_ref.dtype)


# ----------------------- Pallas call wrappers --------------------------------

def gemm_bias_act(x, w, b, relu, residual=None):
    """out = act(x @ w + b [+ residual]), bf16 output.

    x: (M, K) -> bf16, w: (K, N) bf16 (pre-folded BN), b: (1, N) f32,
    residual: optional (M, N), carried as bf16, added before the ReLU."""
    M, K = x.shape
    N = w.shape[1]

    # Tile selection: exact single M tile when M <= 512 (no padding waste),
    # 512-wide tiles otherwise; full-N block when N is not 128-aligned.
    tm = min(512, _round_up(M, 8))
    tn = min(512, N) if N % 128 == 0 else N
    tk = _pick_tk(K)
    Mp = _round_up(M, tm)
    # v7x has two TensorCores: if the grid would otherwise offer a single
    # 'parallel' tile, split N so both cores get work (costs <= one x re-read).
    if Mp // tm == 1 and N // tn == 1 and N >= 256 and (N // 2) % 128 == 0:
        tn = N // 2
    nk = K // tk
    Np = N

    xb = x.astype(jnp.bfloat16)
    wb = w.astype(jnp.bfloat16)
    bb = b.astype(jnp.float32).reshape(1, N)
    if Mp != M:
        xb = jnp.pad(xb, ((0, Mp - M), (0, 0)))

    x_spec = pl.BlockSpec((tm, tk), lambda i, j, k: (i, k))
    w_spec = pl.BlockSpec((tk, tn), lambda i, j, k: (k, j))
    b_spec = pl.BlockSpec((1, tn), lambda i, j, k: (0, j))
    o_spec = pl.BlockSpec((tm, tn), lambda i, j, k: (i, j))

    m_tiles, n_tiles = Mp // tm, Np // tn

    if residual is None:
        kernel = functools.partial(_gemm_kernel, relu=relu)
        in_specs = [x_spec, w_spec, b_spec]
        operands = (xb, wb, bb)
        res_bytes = 0
    else:
        res = residual.astype(jnp.bfloat16)
        if Mp != M:
            res = jnp.pad(res, ((0, Mp - M), (0, 0)))
        kernel = functools.partial(_gemm_res_kernel, relu=relu)
        r_spec = pl.BlockSpec((tm, tn), lambda i, j, k: (i, j))
        in_specs = [x_spec, w_spec, b_spec, r_spec]
        operands = (xb, wb, bb, res)
        res_bytes = Mp * Np * 2

    # bytes_accessed reflects tiled re-reads: x read n_tiles times, w m_tiles times.
    cost = pl.CostEstimate(
        flops=2 * Mp * Np * K,
        transcendentals=0,
        bytes_accessed=(Mp * K * 2 * n_tiles + K * Np * 2 * m_tiles
                        + Mp * Np * 2 + res_bytes))

    out = pl.pallas_call(
        kernel,
        out_shape=jax.ShapeDtypeStruct((Mp, Np), jnp.bfloat16),
        grid_spec=pltpu.PrefetchScalarGridSpec(
            num_scalar_prefetch=0,
            grid=(m_tiles, n_tiles, nk),
            in_specs=in_specs,
            out_specs=o_spec,
            scratch_shapes=[pltpu.VMEM((tm, tn), jnp.float32)]),
        compiler_params=pltpu.CompilerParams(
            dimension_semantics=("parallel", "parallel", "arbitrary"),
            vmem_limit_bytes=32 * 1024 * 1024),
        cost_estimate=cost,
    )(*operands)

    if Mp != M or Np != N:
        out = out[:M, :N]   # drop padded rows (keep this slice: padded rows hold garbage)
    return out


def conv3x3_s1_fused(x, p, relu, residual=None):
    """Fused 3x3 / stride-1 / pad-1 conv with the im2col folded into the kernel.

    The padded frame is flattened to (Hp*Wp, Cin); tap (di, dj) is then a
    contiguous row shift of di*Wp + dj, so each tap is a plain 2-D slice + GEMM
    inside one Pallas invocation per frame — no patch blow-up in HBM.  The
    output is computed at padded width Wp (2 junk columns per row) and cropped
    in glue.  Grid = frames (parallel)."""
    N, H, W, Cin = x.shape
    Cout = p['w'].shape[1]
    Wp = W + 2
    Lp = (H + 3) * Wp          # one extra zero row keeps the last taps in range
    M = H * Wp                 # output rows including per-row junk columns

    xb = x.astype(jnp.bfloat16)
    xp = jnp.pad(xb, ((0, 0), (1, 2), (1, 1), (0, 0))).reshape(N, Lp, Cin)
    w3 = p['w'].reshape(9, Cin, Cout)

    in_specs = [pl.BlockSpec((1, Lp, Cin), lambda n: (n, 0, 0)),
                pl.BlockSpec((9, Cin, Cout), lambda n: (0, 0, 0)),
                pl.BlockSpec((1, Cout), lambda n: (0, 0))]
    args = [xp, w3, p['b']]
    res_bytes = 0
    if residual is None:
        kernel = functools.partial(_conv3x3_kernel, relu=relu, wp=Wp, m=M)
    else:
        res = jnp.pad(residual.astype(jnp.bfloat16),
                      ((0, 0), (0, 0), (0, 2), (0, 0))).reshape(N, M, Cout)
        in_specs.append(pl.BlockSpec((1, M, Cout), lambda n: (n, 0, 0)))
        args.append(res)
        kernel = functools.partial(_conv3x3_res_kernel, relu=relu, wp=Wp, m=M)
        res_bytes = N * M * Cout * 2

    cost = pl.CostEstimate(
        flops=2 * N * M * 9 * Cin * Cout,
        transcendentals=0,
        bytes_accessed=(N * Lp * Cin * 2 + 9 * Cin * Cout * 2
                        + N * M * Cout * 2 + res_bytes))

    out = pl.pallas_call(
        kernel,
        out_shape=jax.ShapeDtypeStruct((N, M, Cout), jnp.bfloat16),
        grid_spec=pltpu.PrefetchScalarGridSpec(
            num_scalar_prefetch=0,
            grid=(N,),
            in_specs=in_specs,
            out_specs=pl.BlockSpec((1, M, Cout), lambda n: (n, 0, 0))),
        compiler_params=pltpu.CompilerParams(
            dimension_semantics=("parallel",),
            vmem_limit_bytes=32 * 1024 * 1024),
        cost_estimate=cost,
    )(*args)

    # crop the 2 junk columns per output row introduced by the flat-shift trick
    return out.reshape(N, H, Wp, Cout)[:, :, :W, :]


# ----------------- JAX glue: conv dispatch, pooling, params ------------------

def conv_bn_act(x, p, stride, pad, relu, residual=None):
    """x: (N,H,W,Cin) NHWC bf16.  p['w']: (k*k*Cin, Cout) bf16 BN-folded,
    p['b']: (1, Cout) f32.  Returns bf16 NHWC output."""
    ksz = p['k']
    if ksz == 3 and stride == 1 and pad == 1:
        return conv3x3_s1_fused(x, p, relu, residual)

    # Fallback path: im2col GEMM (7x7 stem, 1x1 downsamples, stride-2 3x3 convs).
    # TODO(synk): fuse im2col for the stride-2 convs / 7x7 stem as well
    # (needs pl.ANY + manual make_async_copy of the strided taps).
    N, H, W, Cin = x.shape
    Cout = p['w'].shape[1]
    Ho = (H + 2 * pad - ksz) // stride + 1
    Wo = (W + 2 * pad - ksz) // stride + 1
    xb = x.astype(jnp.bfloat16)
    if pad:
        xb = jnp.pad(xb, ((0, 0), (pad, pad), (pad, pad), (0, 0)))
    if ksz == 1 and stride == 1:
        patches = xb.reshape(N * Ho * Wo, Cin)
    else:
        cols = []
        for di in range(ksz):
            for dj in range(ksz):
                cols.append(jax.lax.slice(
                    xb, (0, di, dj, 0),
                    (N, di + stride * (Ho - 1) + 1,
                     dj + stride * (Wo - 1) + 1, Cin),
                    (1, stride, stride, 1)))
        patches = jnp.concatenate(cols, axis=-1).reshape(
            N * Ho * Wo, ksz * ksz * Cin)
    res = None if residual is None else residual.reshape(N * Ho * Wo, Cout)
    out = gemm_bias_act(patches, p['w'], p['b'], relu, res)
    return out.reshape(N, Ho, Wo, Cout)


def maxpool_3x3_s2_p1(x):
    """3x3 / stride-2 / pad-1 max-pool as 9 strided slices + pairwise maximum
    in XLA glue (no 9x stacked tap array)."""
    N, H, W, C = x.shape
    Ho = (H + 2 - 3) // 2 + 1
    Wo = (W + 2 - 3) // 2 + 1
    xp = jnp.pad(x, ((0, 0), (1, 1), (1, 1), (0, 0)),
                 constant_values=-jnp.inf)
    out = None
    for di in range(3):
        for dj in range(3):
            tap = jax.lax.slice(
                xp, (0, di, dj, 0),
                (N, di + 2 * (Ho - 1) + 1, dj + 2 * (Wo - 1) + 1, C),
                (1, 2, 2, 1))
            out = tap if out is None else jnp.maximum(out, tap)
    return out


def make_conv_bn(key, cin, cout, k):
    """Conv weight + inference-mode BatchNorm folded into (w, b); GEMM layout,
    pre-cast to bf16 once at init."""
    k1, k2, k3, k4, k5 = jax.random.split(key, 5)
    fan_in = cin * k * k
    w = jax.random.normal(k1, (k, k, cin, cout), jnp.float32) * jnp.sqrt(2.0 / fan_in)
    gamma = 1.0 + 0.1 * jax.random.normal(k2, (cout,), jnp.float32)
    beta = 0.1 * jax.random.normal(k3, (cout,), jnp.float32)
    rmean = 0.1 * jax.random.normal(k4, (cout,), jnp.float32)
    rvar = 1.0 + 0.1 * jax.random.uniform(k5, (cout,), jnp.float32)
    scale = gamma / jnp.sqrt(rvar + 1e-5)
    w_folded = (w * scale).reshape(k * k * cin, cout).astype(jnp.bfloat16)
    b_folded = (beta - rmean * scale).reshape(1, cout).astype(jnp.float32)
    return {'w': w_folded, 'b': b_folded, 'k': k}


def make_block(key, cin, cout, stride):
    ks = jax.random.split(key, 3)
    blk = {'conv1': make_conv_bn(ks[0], cin, cout, 3),
           'conv2': make_conv_bn(ks[1], cout, cout, 3)}
    if stride != 1 or cin != cout:
        blk['down'] = make_conv_bn(ks[2], cin, cout, 1)   # 1x1 downsample + BN
    return blk


def init_tsn_params(key, num_classes, modality='rgb'):
    in_ch = 3 if modality == 'rgb' else 10
    keys = jax.random.split(key, 16)
    params = {'conv1': make_conv_bn(keys[0], in_ch, 64, 7)}
    cfg = [(64, 1), (128, 2), (256, 2), (512, 2)]
    layers = []
    cin = 64
    for li, (cout, stride) in enumerate(cfg):
        b0 = make_block(keys[1 + 2 * li], cin, cout, stride)
        b1 = make_block(keys[2 + 2 * li], cout, cout, 1)
        layers.append(((b0, stride), (b1, 1)))
        cin = cout
    params['layers'] = layers
    params['fc_w'] = (jax.random.normal(keys[10], (512, num_classes), jnp.float32)
                      / jnp.sqrt(512.0)).astype(jnp.bfloat16)
    params['fc_b'] = 0.01 * jax.random.normal(keys[11], (num_classes,), jnp.float32)
    return params


def basic_block(x, blk, stride):
    out = conv_bn_act(x, blk['conv1'], stride=stride, pad=1, relu=True)
    if 'down' in blk:
        shortcut = conv_bn_act(x, blk['down'], stride=stride, pad=0, relu=False)
    else:
        shortcut = x
    # conv2's BN shift, the residual add and the final ReLU are fused into the
    # conv kernel epilogue (no separate add+ReLU pass, no f32 round-trip).
    return conv_bn_act(out, blk['conv2'], stride=1, pad=1, relu=True,
                       residual=shortcut)


def tsn_forward(params, x):
    """x: (B, T, C, H, W) float32 (PyTorch convention) -> (B, num_classes)."""
    if x.ndim != 5:
        raise ValueError(f'Expected input shape (B, T, C, H, W), got {x.shape}')
    b, t, c, h, w = x.shape
    x = x.astype(jnp.bfloat16).reshape(b * t, c, h, w).transpose(0, 2, 3, 1)  # NCHW -> NHWC
    # ResNet-18 stem
    x = conv_bn_act(x, params['conv1'], stride=2, pad=3, relu=True)
    x = maxpool_3x3_s2_p1(x)
    # layer1..layer4
    for layer in params['layers']:
        for blk, stride in layer:
            x = basic_block(x, blk, stride)
    n, ho, wo, f = x.shape                                   # f == 512
    # AdaptiveAvgPool2d(1) + view(b, t, F) + mean(dim=1) + fc, fused in one kernel:
    # mean over (T, Ho, Wo) == mean over T of per-frame spatial means (equal group sizes).
    feats = x.reshape(b, t * ho * wo, f)                     # bf16
    nc = params['fc_w'].shape[1]
    logits = pl.pallas_call(
        _head_kernel,
        out_shape=jax.ShapeDtypeStruct((b, nc), jnp.float32),
        in_specs=[pl.BlockSpec(memory_space=pltpu.MemorySpace.VMEM)] * 3,
        out_specs=pl.BlockSpec(memory_space=pltpu.MemorySpace.VMEM),
    )(feats, params['fc_w'], params['fc_b'].reshape(1, -1))
    return logits


if __name__ == "__main__":
    key = jax.random.PRNGKey(0)
    pkey, xkey = jax.random.split(key)
    num_classes = 10
    num_segments = 4
    params = init_tsn_params(pkey, num_classes, modality='rgb')
    # (B, T, C, H, W) = (2, 4, 3, 32, 32): small but fully exercises the net.
    x = jax.random.normal(xkey, (2, num_segments, 3, 32, 32), jnp.float32)
    out = tsn_forward(params, x)
    out = jax.block_until_ready(out)
    assert out.shape == (2, num_classes), out.shape
    assert bool(jnp.all(jnp.isfinite(out)))
    print("KERNEL_OK")
</pallas_src>

<mosaic_0001>
module attributes {stable_mosaic.version = 11 : i64} {
  func.func @_gemm_kernel(%arg0: i32, %arg1: i32, %arg2: i32, %arg3: memref<512x147xbf16, #tpu.memory_space<vmem>>, %arg4: memref<147x64xbf16, #tpu.memory_space<vmem>>, %arg5: memref<1x64xf32, #tpu.memory_space<vmem>>, %arg6: memref<512x64xbf16, #tpu.memory_space<vmem>>, %arg7: memref<512x64xf32, #tpu.memory_space<vmem>>) attributes {dimension_semantics = [#tpu.dimension_semantics<parallel>, #tpu.dimension_semantics<parallel>, #tpu.dimension_semantics<arbitrary>], iteration_bounds = array<i64: 4, 1, 1>, scalar_prefetch = 0 : i64, scratch_operands = 1 : i64, tpu.core_type = #tpu.core_type<tc>, window_params = [{transform_indices = @transform_0, window_bounds = array<i64: 512, 147>}, {transform_indices = @transform_1, window_bounds = array<i64: 147, 64>}, {transform_indices = @transform_2, window_bounds = array<i64: 1, 64>}, {transform_indices = @transform_3, window_bounds = array<i64: 512, 64>}]} {
    %c0_i32 = arith.constant 0 : i32
    %0 = arith.cmpi eq, %arg2, %c0_i32 : i32
    %1 = arith.extui %0 : i1 to i32
    %c0_i32_0 = arith.constant 0 : i32
    %2 = arith.cmpi ne, %1, %c0_i32_0 : i32
    scf.if %2 {
      %cst_10 = arith.constant 0.000000e+00 : f32
      %12 = vector.broadcast %cst_10 : f32 to vector<512x64xf32>
      %c0_11 = arith.constant 0 : index
      %c0_12 = arith.constant 0 : index
      %13 = vector.load %arg7[%c0_11, %c0_12] : memref<512x64xf32, #tpu.memory_space<vmem>>, vector<512x64xf32>
      tpu.vector_store %arg7[%c0_11, %c0_12], %12 {strides = array<i32>} : memref<512x64xf32, #tpu.memory_space<vmem>>, vector<512x64xf32>,
    } else {
    }
    %c0 = arith.constant 0 : index
    %c0_1 = arith.constant 0 : index
    %3 = vector.load %arg7[%c0, %c0_1] : memref<512x64xf32, #tpu.memory_space<vmem>>, vector<512x64xf32>
    %c0_2 = arith.constant 0 : index
    %c0_3 = arith.constant 0 : index
    %4 = vector.load %arg3[%c0_2, %c0_3] : memref<512x147xbf16, #tpu.memory_space<vmem>>, vector<512x147xbf16>
    %c0_4 = arith.constant 0 : index
    %c0_5 = arith.constant 0 : index
    %5 = vector.load %arg4[%c0_4, %c0_5] : memref<147x64xbf16, #tpu.memory_space<vmem>>, vector<147x64xbf16>
    %cst = arith.constant dense<0.000000e+00> : vector<512x64xf32>
    %6 = tpu.matmul %4, %5, %cst {dimension_numbers = #tpu.dot_dimension_numbers<[1], [0], [0], [1], [0, 0, 1, 1], [], []>} : vector<512x147xbf16>, vector<147x64xbf16>, vector<512x64xf32> -> vector<512x64xf32>
    %7 = arith.addf %3, %6 : vector<512x64xf32>
    %c0_6 = arith.constant 0 : index
    %c0_7 = arith.constant 0 : index
    %8 = vector.load %arg7[%c0_6, %c0_7] : memref<512x64xf32, #tpu.memory_space<vmem>>, vector<512x64xf32>
    tpu.vector_store %arg7[%c0_6, %c0_7], %7 {strides = array<i32>} : memref<512x64xf32, #tpu.memory_space<vmem>>, vector<512x64xf32>,
    %c0_i32_8 = arith.constant 0 : i32
    %9 = arith.cmpi eq, %arg2, %c0_i32_8 : i32
    %10 = arith.extui %9 : i1 to i32
    %c0_i32_9 = arith.constant 0 : i32
    %11 = arith.cmpi ne, %10, %c0_i32_9 : i32
    scf.if %11 {
      %c0_10 = arith.constant 0 : index
      %c0_11 = arith.constant 0 : index
      %12 = vector.load %arg7[%c0_10, %c0_11] : memref<512x64xf32, #tpu.memory_space<vmem>>, vector<512x64xf32>
      %c0_12 = arith.constant 0 : index
      %c0_13 = arith.constant 0 : index
      %13 = vector.load %arg5[%c0_12, %c0_13] : memref<1x64xf32, #tpu.memory_space<vmem>>, vector<1x64xf32>
      %14 = vector.broadcast %13 : vector<1x64xf32> to vector<512x64xf32>
      %15 = arith.addf %12, %14 : vector<512x64xf32>
      %cst_14 = arith.constant 0.000000e+00 : f32
      %16 = vector.broadcast %cst_14 : f32 to vector<512x64xf32>
      %17 = arith.maximumf %15, %16 : vector<512x64xf32>
      %18 = arith.truncf %17 : vector<512x64xf32> to vector<512x64xbf16>
      %c0_15 = arith.constant 0 : index
      %c0_16 = arith.constant 0 : index
      %19 = vector.load %arg6[%c0_15, %c0_16] : memref<512x64xbf16, #tpu.memory_space<vmem>>, vector<512x64xbf16>
      tpu.vector_store %arg6[%c0_15, %c0_16], %18 {strides = array<i32>} : memref<512x64xbf16, #tpu.memory_space<vmem>>, vector<512x64xbf16>,
    } else {
    }
    return
  }
  func.func @transform_0(%arg0: i32, %arg1: i32, %arg2: i32) -> (i32, i32) {
    %c0_i32 = arith.constant 0 : i32
    return %arg0, %arg2 : i32, i32
  }
  func.func @transform_1(%arg0: i32, %arg1: i32, %arg2: i32) -> (i32, i32) {
    %c0_i32 = arith.constant 0 : i32
    return %arg2, %arg1 : i32, i32
  }
  func.func @transform_2(%arg0: i32, %arg1: i32, %arg2: i32) -> (i32, i32) {
    %c0_i32 = arith.constant 0 : i32
    %c0_i32_0 = arith.constant 0 : i32
    return %c0_i32, %arg1 : i32, i32
  }
  func.func @transform_3(%arg0: i32, %arg1: i32, %arg2: i32) -> (i32, i32) {
    %c0_i32 = arith.constant 0 : i32
    return %arg0, %arg1 : i32, i32
  }
}

</mosaic_0001>

<bundles_post_ra>
// kernel: tpu_custom_call.1
= control target key start
LH: loop header
LB: loop body
LE: loop exit
PB: predicated region body
PF: predicated region fallthrough
CT: control target
= control target key end

     0   :  { %s2439_s12 = smov 0   ;;  %s2441_s13 = smov 0   ;;  %s3024_s0 = inlined_call_operand.vmem [shape: bf16[2048,147], index: 0, kind: input, shape index: {}]   ;;  %s3025_s1 = inlined_call_operand.vmem [shape: bf16[147,64], index: 1, kind: input, shape index: {}]   ;;  %s3026_s2 = inlined_call_operand.vmem [shape: f32[1,64], index: 2, kind: input, shape index: {}]   ;;  %s3027_s3 = inlined_call_operand.vmem [shape: bf16[2048,64], index: 3, kind: output, shape index: {}]  }
   0x1   :  { %s2443_s14 = smov 0  }
   0x2 LB: > { %s32_s15 = sadd.s32 1, %s2410_s13  ;;  %p1994_p0 = scmp.ge.s32.totalorder %s2414_s14, 1  ;;  %s2414_s14 = sphi %s2443_s14, %s13_s14   ;;  %s2410_s13 = sphi %s2441_s13, %s3029_s13   ;;  %s2406_s12 = sphi %s2439_s12, %s3028_s12  }
   0x3   : > { %p34_p1 = scmp.ge.s32.totalorder %s32_s15, 4  ;;  %p191_p2 = scmp.lt.s32.totalorder %s2414_s14, 5 }
   0x5   : > { %s3031_s15 = smov (%p34_p1, %s32_s15), 0  ;;  %p192_p3 = pnand %p1994_p0, %p191_p2 }
   0x6   : > { %v2285_v0 = vld [vmem:[%s3025_s1] sm:$0xff] (!%p192_p3)   ;;  %v2416_v1 = vmov (!%p192_p3), 0   ;;  %v2286_v2 = vld [vmem:[%s3025_s1 + $0x8] sm:$0xff] (!%p192_p3)   ;;  %v2287_v3 = vld [vmem:[%s3025_s1 + $0x10] sm:$0xff] (!%p192_p3)   ;;  %s1995_s22 = sshll.u32 (!%p192_p3), %s2406_s12, 6  ;;  %vm829_vm0 = vcmask (!%p192_p3), 154624  }
   0x7   : > { %195 = sbr.rel (%p192_p3) target bundleno = 401 (0x191), region = 32  ;;  %933 = vmatprep.subr.bf16.mxu0 (!%p192_p3), %v2416_v1  ;;  %2238 = vmatprep.subr.bf16.mxu1 (!%p192_p3), %v2416_v1  ;;  %p236_p4 = scmp.lt.s32.totalorder (!%p192_p3), %s1995_s22, 255  ;;  %v2288_v4 = vld [vmem:[%s3025_s1 + $0x18] sm:$0xff] (!%p192_p3)   ;;  %v2289_v5 = vld [vmem:[%s3025_s1 + $0x20] sm:$0xff] (!%p192_p3)   ;;  %v2290_v8 = vld [vmem:[%s3025_s1 + $0x28] sm:$0xff] (!%p192_p3)   ;;  %vm926_vm1 = vcmask (!%p192_p3), 1040384  }
   0x8   : > { %934 = vmatpush1.bf16.msra.mxu0 (!%p192_p3), %v2285_v0  ;;  %2248 = vmatpush1.bf16.msra.mxu1 (!%p192_p3), %v2285_v0  ;;  %v2291_v9 = vld [vmem:[%s3025_s1 + $0x30] sm:$0xff] (!%p192_p3)   ;;  %v2292_v10 = vld [vmem:[%s3025_s1 + $0x38] sm:$0xff] (!%p192_p3)   ;;  %vm927_vm2 = vcmask (!%p192_p3), 1041408   ;;  %v2417_v11 = vmov (!%p192_p3), 65535   ;;  %v2293_v13 = vld [vmem:[%s3025_s1 + $0x40] sm:$0xff] (!%p192_p3)   ;;  %vm272_vm3 = vcmask (!%p192_p3), 523264  }
   0x9   : > { %935 = vmatprep.subr.bf16.mxu0 (!%p192_p3), %v2416_v1  ;;  %2239 = vmatprep.subr.bf16.mxu1 (!%p192_p3), %v2416_v1  ;;  %v928_v12 = vsel (!%p192_p3), %vm926_vm1, 4294967295, %v2417_v11  ;;  %v2294_v14 = vld [vmem:[%s3025_s1 + $0x48] ss:$0 sps:$4 sm:$0x33] (!%p192_p3)   ;;  %v2418_v17 = vmov (!%p192_p3), 0.0   ;;  %vm1809_vm4 = vcmask (!%p192_p3), 519168  }
   0xa   : > { %v929_v15 = vsel (!%p192_p3), %vm927_vm2, %v928_v12, 0  ;;  %273 = vst.msk [vmem:[#allocation2] sm:$0xff] (!%p192_p3), %vm272_vm3, %v2418_v17  ;;  %274 = vst.msk [vmem:[#allocation2 + $0x8] sm:$0xff] (!%p192_p3), %vm272_vm3, %v2418_v17 }
   0xb   : > { %v2517_v16 = vand.u32 (!%p192_p3), %v2294_v14, %v929_v15  ;;  %275 = vst.msk [vmem:[#allocation2 + $0x10] sm:$0xff] (!%p192_p3), %vm272_vm3, %v2418_v17  ;;  %276 = vst.msk [vmem:[#allocation2 + $0x18] sm:$0xff] (!%p192_p3), %vm272_vm3, %v2418_v17 }
   0xc   : > { %936 = vmatpush1.bf16.msra.mxu0 (!%p192_p3), %v2286_v2  ;;  %2249 = vmatpush1.bf16.msra.mxu1 (!%p192_p3), %v2286_v2  ;;  %277 = vst.msk [vmem:[#allocation2 + $0x20] sm:$0xff] (!%p192_p3), %vm272_vm3, %v2418_v17  ;;  %278 = vst.msk [vmem:[#allocation2 + $0x28] sm:$0xff] (!%p192_p3), %vm272_vm3, %v2418_v17 }
   0xd   : > { %937 = vmatprep.subr.bf16.mxu0 (!%p192_p3), %v2416_v1  ;;  %2240 = vmatprep.subr.bf16.mxu1 (!%p192_p3), %v2416_v1  ;;  %279 = vst.msk [vmem:[#allocation2 + $0x30] sm:$0xff] (!%p192_p3), %vm272_vm3, %v2418_v17  ;;  %280 = vst.msk [vmem:[#allocation2 + $0x38] sm:$0xff] (!%p192_p3), %vm272_vm3, %v2418_v17 }
   0xe   : > { %s3033_s22 = smov (!%p236_p4, %s1995_s22), 255  ;;  %281 = vst.msk [vmem:[#allocation2 + $0x40] sm:$0xff] %vm272_vm3, %v2418_v17  ;;  %282 = vst.msk [vmem:[#allocation2 + $0x48] sm:$0xff] %vm272_vm3, %v2418_v17 }
   0xf   : > { %s2173_s25 = sshll.u32 %s3033_s22, 3  ;;  %283 = vst.msk [vmem:[#allocation2 + $0x50] sm:$0xff] %vm272_vm3, %v2418_v17  ;;  %284 = vst.msk [vmem:[#allocation2 + $0x58] sm:$0xff] %vm272_vm3, %v2418_v17  ;;  %s1999_s19 = sshll.u32 %s3033_s22, 2 }
  0x10   : > { %938 = vmatpush1.bf16.msra.mxu0 %v2287_v3  ;;  %2250 = vmatpush1.bf16.msra.mxu1 %v2287_v3  ;;  %s2483_s28 = scalar_lea.vmem %s3024_s0, %s2173_s25  ;;  %285 = vst.msk [vmem:[#allocation2 + $0x60] sm:$0xff] %vm272_vm3, %v2418_v17  ;;  %286 = vst.msk [vmem:[#allocation2 + $0x68] sm:$0xff] %vm272_vm3, %v2418_v17  ;;  %s2764_s22 = scalar_lea.vmem %s3027_s3, %s1999_s19 }
  0x11   : > { %939 = vmatprep.subr.bf16.mxu0 %v2416_v1  ;;  %2241 = vmatprep.subr.bf16.mxu1 %v2416_v1  ;;  %v2297_v6 = vld [vmem:[%s2483_s28 + $0x4] ss:$8 sps:$4 sm:$0xff]   ;;  %287 = vst.msk [vmem:[#allocation2 + $0x70] sm:$0xff] %vm272_vm3, %v2418_v17  ;;  %288 = vst.msk [vmem:[#allocation2 + $0x78] sm:$0xff] %vm272_vm3, %v2418_v17  ;;  %v2295_v18 = vld [vmem:[%s2483_s28] ss:$8 sps:$4 sm:$0xff]  }
  0x12   : > { %v2300_v7 = vld [vmem:[%s2483_s28 + $0x104] ss:$8 sps:$4 sm:$0xff]   ;;  %2074 = vmatprep.mubr.msk.bf16.mxu0 %vm829_vm0, %v2297_v6  ;;  %289 = vst.msk [vmem:[#allocation2 + $0x80] sm:$0xff] %vm272_vm3, %v2418_v17  ;;  %290 = vst.msk [vmem:[#allocation2 + $0x88] sm:$0xff] %vm272_vm3, %v2418_v17  ;;  %v2298_v19 = vld [vmem:[%s2483_s28 + $0x100] ss:$8 sps:$4 sm:$0xff]  }
  0x13   : > { %2090 = vmatprep.mubr.msk.bf16.mxu1 %vm829_vm0, %v2300_v7  ;;  %291 = vst.msk [vmem:[#allocation2 + $0x90] sm:$0xff] %vm272_vm3, %v2418_v17  ;;  %292 = vst.msk [vmem:[#allocation2 + $0x98] sm:$0xff] %vm272_vm3, %v2418_v17  ;;  %v2301_v20 = vld [vmem:[%s2483_s28 + $0x14] ss:$8 sps:$4 sm:$0xff]   ;;  %v2305_v22 = vld [vmem:[%s2483_s28 + $0x10] ss:$8 sps:$4 sm:$0xff]  }
  0x14   : > { %940 = vmatpush1.bf16.msra.mxu0 %v2288_v4  ;;  %2251 = vmatpush1.bf16.msra.mxu1 %v2288_v4  ;;  %293 = vst.msk [vmem:[#allocation2 + $0xa0] sm:$0xff] %vm272_vm3, %v2418_v17  ;;  %294 = vst.msk [vmem:[#allocation2 + $0xa8] sm:$0xff] %vm272_vm3, %v2418_v17  ;;  %v2303_v21 = vld [vmem:[%s2483_s28 + $0x114] ss:$8 sps:$4 sm:$0xff]   ;;  %v2306_v23 = vld [vmem:[%s2483_s28 + $0x110] ss:$8 sps:$4 sm:$0xff]  }
  0x15   : > { %941 = vmatprep.subr.bf16.mxu0 %v2416_v1  ;;  %2242 = vmatprep.subr.bf16.mxu1 %v2416_v1  ;;  %295 = vst.msk [vmem:[#allocation2 + $0xb0] sm:$0xff] %vm272_vm3, %v2418_v17  ;;  %296 = vst.msk [vmem:[#allocation2 + $0xb8] sm:$0xff] %vm272_vm3, %v2418_v17  ;;  %v2307_v24 = vld [vmem:[%s2483_s28 + $0x24] ss:$8 sps:$4 sm:$0xff]   ;;  %v2311_v26 = vld [vmem:[%s2483_s28 + $0x20] ss:$8 sps:$4 sm:$0xff]  }
  0x16   : > { %297 = vst.msk [vmem:[#allocation2 + $0xc0] sm:$0xff] %vm272_vm3, %v2418_v17  ;;  %298 = vst.msk [vmem:[#allocation2 + $0xc8] sm:$0xff] %vm272_vm3, %v2418_v17  ;;  %v2309_v25 = vld [vmem:[%s2483_s28 + $0x124] ss:$8 sps:$4 sm:$0xff]   ;;  %v2312_v27 = vld [vmem:[%s2483_s28 + $0x120] ss:$8 sps:$4 sm:$0xff]  }
  0x17   : > { %299 = vst.msk [vmem:[#allocation2 + $0xd0] sm:$0xff] %vm272_vm3, %v2418_v17  ;;  %300 = vst.msk [vmem:[#allocation2 + $0xd8] sm:$0xff] %vm272_vm3, %v2418_v17  ;;  %v2313_v28 = vld [vmem:[%s2483_s28 + $0x34] ss:$8 sps:$4 sm:$0xff]   ;;  %v2317_v30 = vld [vmem:[%s2483_s28 + $0x30] ss:$8 sps:$4 sm:$0xff]  }
  0x18   : > { %942 = vmatpush1.bf16.msra.mxu0 %v2289_v5  ;;  %2252 = vmatpush1.bf16.msra.mxu1 %v2289_v5  ;;  %301 = vst.msk [vmem:[#allocation2 + $0xe0] sm:$0xff] %vm272_vm3, %v2418_v17  ;;  %302 = vst.msk [vmem:[#allocation2 + $0xe8] sm:$0xff] %vm272_vm3, %v2418_v17  ;;  %v2315_v29 = vld [vmem:[%s2483_s28 + $0x134] ss:$8 sps:$4 sm:$0xff]   ;;  %v2318_v31 = vld [vmem:[%s2483_s28 + $0x130] ss:$8 sps:$4 sm:$0xff]  }
  0x19   : > { %943 = vmatprep.subr.bf16.mxu0 %v2416_v1  ;;  %2243 = vmatprep.subr.bf16.mxu1 %v2416_v1  ;;  %303 = vst.msk [vmem:[#allocation2 + $0xf0] sm:$0xff] %vm272_vm3, %v2418_v17  ;;  %304 = vst.msk [vmem:[#allocation2 + $0xf8] sm:$0xff] %vm272_vm3, %v2418_v17  ;;  %v2319_v32 = vld [vmem:[%s2483_s28 + $0x44] ss:$8 sps:$4 sm:$0xff]   ;;  %v2323_v34 = vld [vmem:[%s2483_s28 + $0x40] ss:$8 sps:$4 sm:$0xff]  }
  0x1a   : > { %305 = vst.msk [vmem:[#allocation2 + $0x100] sm:$0xff] %vm272_vm3, %v2418_v17  ;;  %306 = vst.msk [vmem:[#allocation2 + $0x108] sm:$0xff] %vm272_vm3, %v2418_v17  ;;  %v2321_v33 = vld [vmem:[%s2483_s28 + $0x144] ss:$8 sps:$4 sm:$0xff]   ;;  %v2324_v35 = vld [vmem:[%s2483_s28 + $0x140] ss:$8 sps:$4 sm:$0xff]  }
  0x1b   : > { %307 = vst.msk [vmem:[#allocation2 + $0x110] sm:$0xff] %vm272_vm3, %v2418_v17  ;;  %308 = vst.msk [vmem:[#allocation2 + $0x118] sm:$0xff] %vm272_vm3, %v2418_v17  ;;  %v2325_v36 = vld [vmem:[%s2483_s28 + $0x54] ss:$8 sps:$4 sm:$0xff]   ;;  %v2329_v38 = vld [vmem:[%s2483_s28 + $0x50] ss:$8 sps:$4 sm:$0xff]  }
  0x1c   : > { %944 = vmatpush1.bf16.msra.mxu0 %v2290_v8  ;;  %2253 = vmatpush1.bf16.msra.mxu1 %v2290_v8  ;;  %309 = vst.msk [vmem:[#allocation2 + $0x120] sm:$0xff] %vm272_vm3, %v2418_v17  ;;  %310 = vst.msk [vmem:[#allocation2 + $0x128] sm:$0xff] %vm272_vm3, %v2418_v17  ;;  %v2327_v37 = vld [vmem:[%s2483_s28 + $0x154] ss:$8 sps:$4 sm:$0xff]   ;;  %v2330_v39 = vld [vmem:[%s2483_s28 + $0x150] ss:$8 sps:$4 sm:$0xff]  }
  0x1d   : > { %945 = vmatprep.subr.bf16.mxu0 %v2416_v1  ;;  %2244 = vmatprep.subr.bf16.mxu1 %v2416_v1  ;;  %311 = vst.msk [vmem:[#allocation2 + $0x130] sm:$0xff] %vm272_vm3, %v2418_v17  ;;  %312 = vst.msk [vmem:[#allocation2 + $0x138] sm:$0xff] %vm272_vm3, %v2418_v17  ;;  %v2331_v40 = vld [vmem:[%s2483_s28 + $0x64] ss:$8 sps:$4 sm:$0xff]   ;;  %v2335_v42 = vld [vmem:[%s2483_s28 + $0x60] ss:$8 sps:$4 sm:$0xff]  }
  0x1e   : > { %313 = vst.msk [vmem:[#allocation2 + $0x140] sm:$0xff] %vm272_vm3, %v2418_v17  ;;  %314 = vst.msk [vmem:[#allocation2 + $0x148] sm:$0xff] %vm272_vm3, %v2418_v17  ;;  %v2333_v41 = vld [vmem:[%s2483_s28 + $0x164] ss:$8 sps:$4 sm:$0xff]   ;;  %v2336_v43 = vld [vmem:[%s2483_s28 + $0x160] ss:$8 sps:$4 sm:$0xff]  }
  0x1f   : > { %315 = vst.msk [vmem:[#allocation2 + $0x150] sm:$0xff] %vm272_vm3, %v2418_v17  ;;  %316 = vst.msk [vmem:[#allocation2 + $0x158] sm:$0xff] %vm272_vm3, %v2418_v17  ;;  %v2337_v44 = vld [vmem:[%s2483_s28 + $0x74] ss:$8 sps:$4 sm:$0xff]   ;;  %v2341_v46 = vld [vmem:[%s2483_s28 + $0x70] ss:$8 sps:$4 sm:$0xff]  }
  0x20   : > { %946 = vmatpush1.bf16.msra.mxu0 %v2291_v9  ;;  %2254 = vmatpush1.bf16.msra.mxu1 %v2291_v9  ;;  %317 = vst.msk [vmem:[#allocation2 + $0x160] sm:$0xff] %vm272_vm3, %v2418_v17  ;;  %318 = vst.msk [vmem:[#allocation2 + $0x168] sm:$0xff] %vm272_vm3, %v2418_v17  ;;  %v2339_v45 = vld [vmem:[%s2483_s28 + $0x174] ss:$8 sps:$4 sm:$0xff]   ;;  %v2342_v47 = vld [vmem:[%s2483_s28 + $0x170] ss:$8 sps:$4 sm:$0xff]  }
  0x21   : > { %947 = vmatprep.subr.bf16.mxu0 %v2416_v1  ;;  %2245 = vmatprep.subr.bf16.mxu1 %v2416_v1  ;;  %319 = vst.msk [vmem:[#allocation2 + $0x170] sm:$0xff] %vm272_vm3, %v2418_v17  ;;  %320 = vst.msk [vmem:[#allocation2 + $0x178] sm:$0xff] %vm272_vm3, %v2418_v17  ;;  %v2343_v48 = vld [vmem:[%s2483_s28 + $0x84] ss:$8 sps:$4 sm:$0xff]   ;;  %v2347_v50 = vld [vmem:[%s2483_s28 + $0x80] ss:$8 sps:$4 sm:$0xff]  }
  0x22   : > { %321 = vst.msk [vmem:[#allocation2 + $0x180] sm:$0xff] %vm272_vm3, %v2418_v17  ;;  %322 = vst.msk [vmem:[#allocation2 + $0x188] sm:$0xff] %vm272_vm3, %v2418_v17  ;;  %v2345_v49 = vld [vmem:[%s2483_s28 + $0x184] ss:$8 sps:$4 sm:$0xff]   ;;  %v2348_v51 = vld [vmem:[%s2483_s28 + $0x180] ss:$8 sps:$4 sm:$0xff]  }
  0x23   : > { %323 = vst.msk [vmem:[#allocation2 + $0x190] sm:$0xff] %vm272_vm3, %v2418_v17  ;;  %324 = vst.msk [vmem:[#allocation2 + $0x198] sm:$0xff] %vm272_vm3, %v2418_v17  ;;  %v2349_v52 = vld [vmem:[%s2483_s28 + $0x94] ss:$8 sps:$4 sm:$0xff]   ;;  %v2353_v54 = vld [vmem:[%s2483_s28 + $0x90] ss:$8 sps:$4 sm:$0xff]  }
  0x24   : > { %948 = vmatpush1.bf16.msra.mxu0 %v2292_v10  ;;  %2255 = vmatpush1.bf16.msra.mxu1 %v2292_v10  ;;  %325 = vst.msk [vmem:[#allocation2 + $0x1a0] sm:$0xff] %vm272_vm3, %v2418_v17  ;;  %326 = vst.msk [vmem:[#allocation2 + $0x1a8] sm:$0xff] %vm272_vm3, %v2418_v17  ;;  %v2351_v53 = vld [vmem:[%s2483_s28 + $0x194] ss:$8 sps:$4 sm:$0xff]   ;;  %v2354_v55 = vld [vmem:[%s2483_s28 + $0x190] ss:$8 sps:$4 sm:$0xff]  }
  0x25   : > { %949 = vmatprep.subr.bf16.mxu0 %v2416_v1  ;;  %2246 = vmatprep.subr.bf16.mxu1 %v2416_v1  ;;  %327 = vst.msk [vmem:[#allocation2 + $0x1b0] sm:$0xff] %vm272_vm3, %v2418_v17  ;;  %328 = vst.msk [vmem:[#allocation2 + $0x1b8] sm:$0xff] %vm272_vm3, %v2418_v17  ;;  %v2355_v56 = vld [vmem:[%s2483_s28 + $0xa4] ss:$8 sps:$4 sm:$0xff]   ;;  %v2359_v58 = vld [vmem:[%s2483_s28 + $0xa0] ss:$8 sps:$4 sm:$0xff]  }
  0x26   : > { %329 = vst.msk [vmem:[#allocation2 + $0x1c0] sm:$0xff] %vm272_vm3, %v2418_v17  ;;  %330 = vst.msk [vmem:[#allocation2 + $0x1c8] sm:$0xff] %vm272_vm3, %v2418_v17  ;;  %v2357_v57 = vld [vmem:[%s2483_s28 + $0x1a4] ss:$8 sps:$4 sm:$0xff]   ;;  %v2360_v59 = vld [vmem:[%s2483_s28 + $0x1a0] ss:$8 sps:$4 sm:$0xff]  }
  0x27   : > { %331 = vst.msk [vmem:[#allocation2 + $0x1d0] sm:$0xff] %vm272_vm3, %v2418_v17  ;;  %332 = vst.msk [vmem:[#allocation2 + $0x1d8] sm:$0xff] %vm272_vm3, %v2418_v17  ;;  %v2361_v60 = vld [vmem:[%s2483_s28 + $0xb4] ss:$8 sps:$4 sm:$0xff]   ;;  %v2365_v62 = vld [vmem:[%s2483_s28 + $0xb0] ss:$8 sps:$4 sm:$0xff]  }
  0x28   : > { %950 = vmatpush1.bf16.msra.mxu0 %v2293_v13  ;;  %2256 = vmatpush1.bf16.msra.mxu1 %v2293_v13  ;;  %333 = vst.msk [vmem:[#allocation2 + $0x1e0] sm:$0xff] %vm272_vm3, %v2418_v17  ;;  %334 = vst.msk [vmem:[#allocation2 + $0x1e8] sm:$0xff] %vm272_vm3, %v2418_v17  ;;  %v2363_v61 = vld [vmem:[%s2483_s28 + $0x1b4] ss:$8 sps:$4 sm:$0xff]   ;;  %v2366_v63 = vld [vmem:[%s2483_s28 + $0x1b0] ss:$8 sps:$4 sm:$0xff]  }
  0x29   : > { %951 = vmatprep.subr.bf16.mxu0 %v2416_v1  ;;  %2247 = vmatprep.subr.bf16.mxu1 %v2416_v1  ;;  %335 = vst.msk [vmem:[#allocation2 + $0x1f0] sm:$0xff] %vm272_vm3, %v2418_v17  ;;  %336 = vst.msk [vmem:[#allocation2 + $0x1f8] sm:$0xff] %vm272_vm3, %v2418_v17  ;;  %v2367_v0 = vld [vmem:[%s2483_s28 + $0xc4] ss:$8 sps:$4 sm:$0xff]   ;;  %v2371_v2 = vld [vmem:[%s2483_s28 + $0xc0] ss:$8 sps:$4 sm:$0xff]  }
  0x2a   : > { %v2369_v1 = vld [vmem:[%s2483_s28 + $0x1c4] ss:$8 sps:$4 sm:$0xff]   ;;  %v2372_v3 = vld [vmem:[%s2483_s28 + $0x1c0] ss:$8 sps:$4 sm:$0xff]   ;;  %v2373_v4 = vld [vmem:[%s2483_s28 + $0xd4] ss:$8 sps:$4 sm:$0xff]  }
  0x2b   : > { %v2375_v5 = vld [vmem:[%s2483_s28 + $0x1d4] ss:$8 sps:$4 sm:$0xff]   ;;  %v2377_v6 = vld [vmem:[%s2483_s28 + $0xd0] ss:$8 sps:$4 sm:$0xff]   ;;  %v2379_v8 = vld [vmem:[%s2483_s28 + $0xe4] ss:$8 sps:$4 sm:$0xff]  }
  0x2c   : > { %952 = vmatpush1.bf16.msra.mxu0 %v2517_v16  ;;  %2257 = vmatpush1.bf16.msra.mxu1 %v2517_v16  ;;  %v2378_v7 = vld [vmem:[%s2483_s28 + $0x1d0] ss:$8 sps:$4 sm:$0xff]   ;;  %v2381_v9 = vld [vmem:[%s2483_s28 + $0x1e4] ss:$8 sps:$4 sm:$0xff]   ;;  %v2383_v10 = vld [vmem:[%s2483_s28 + $0xe0] ss:$8 sps:$4 sm:$0xff]  }
  0x2d   : > { %v2384_v11 = vld [vmem:[%s2483_s28 + $0x1e0] ss:$8 sps:$4 sm:$0xff]   ;;  %v2385_v12 = vld [vmem:[%s2483_s28 + $0xf4] ss:$8 sps:$4 sm:$0xff]   ;;  %v2389_v14 = vld [vmem:[%s2483_s28 + $0xf0] ss:$8 sps:$4 sm:$0xff]  }
  0x2e   : > { %v2387_v13 = vld [vmem:[%s2483_s28 + $0x1f4] ss:$8 sps:$4 sm:$0xff]   ;;  %v2390_v15 = vld [vmem:[%s2483_s28 + $0x1f0] ss:$8 sps:$4 sm:$0xff]   ;;  %v337_v16 = vld [vmem:[#allocation2] sm:$0xff] }
  0x2f   : > { %966 = vmatmul.mubr.bf16.vlgmr.msra.gmra.mrb[0].mxu0 %v2295_v18  ;;  %1094 = vmatmul.mubr.bf16.vlgmr.msra.gmra.mrb[0].mxu1 %v2298_v19  ;;  %v369_v17 = vld [vmem:[#allocation2 + $0x100] sm:$0xff] }
  0x30   : > { %2075 = vmatprep.mubr.msk.bf16.mxu0 %vm829_vm0, %v2301_v20  ;;  %2091 = vmatprep.mubr.msk.bf16.mxu1 %vm829_vm0, %v2303_v21  ;;  %v338_v20 = vld [vmem:[#allocation2 + $0x8] sm:$0xff] }
  0x31   : > { %v370_v21 = vld [vmem:[#allocation2 + $0x108] sm:$0xff] }
  0x37   : > { %974 = vmatmul.mubr.bf16.gmra.mrb[4].mxu0 %v2305_v22  ;;  %1102 = vmatmul.mubr.bf16.gmra.mrb[4].mxu1 %v2306_v23 }
  0x38   : > { %2076 = vmatprep.mubr.msk.bf16.mxu0 %vm829_vm0, %v2307_v24  ;;  %2092 = vmatprep.mubr.msk.bf16.mxu1 %vm829_vm0, %v2309_v25 }
  0x3f   : > { %982 = vmatmul.mubr.bf16.gmra.mrb[8].mxu0 %v2311_v26  ;;  %1110 = vmatmul.mubr.bf16.gmra.mrb[8].mxu1 %v2312_v27 }
  0x40   : > { %2077 = vmatprep.mubr.msk.bf16.mxu0 %vm829_vm0, %v2313_v28  ;;  %2093 = vmatprep.mubr.msk.bf16.mxu1 %vm829_vm0, %v2315_v29 }
  0x47   : > { %990 = vmatmul.mubr.bf16.gmra.mrb[12].mxu0 %v2317_v30  ;;  %1118 = vmatmul.mubr.bf16.gmra.mrb[12].mxu1 %v2318_v31 }
  0x48   : > { %2078 = vmatprep.mubr.msk.bf16.mxu0 %vm829_vm0, %v2319_v32  ;;  %2094 = vmatprep.mubr.msk.bf16.mxu1 %vm829_vm0, %v2321_v33  ;;  %v339_v32 = vld [vmem:[#allocation2 + $0x10] sm:$0xff] }
  0x49   : > { %v371_v33 = vld [vmem:[#allocation2 + $0x110] sm:$0xff] }
  0x4f   : > { %998 = vmatmul.mubr.bf16.gmra.mrb[16].mxu0 %v2323_v34  ;;  %1126 = vmatmul.mubr.bf16.gmra.mrb[16].mxu1 %v2324_v35  ;;  %v2750_v34 = vld [vmem:[%s3026_s2] ss:$0 sm:$0xff] }
  0x50   : > { %2079 = vmatprep.mubr.msk.bf16.mxu0 %vm829_vm0, %v2325_v36  ;;  %2095 = vmatprep.mubr.msk.bf16.mxu1 %vm829_vm0, %v2327_v37  ;;  %v340_v37 = vld [vmem:[#allocation2 + $0x18] sm:$0xff] }
  0x57   : > { %1006 = vmatmul.mubr.bf16.gmra.mrb[20].mxu0 %v2329_v38  ;;  %1134 = vmatmul.mubr.bf16.gmra.mrb[20].mxu1 %v2330_v39  ;;  %v372_v38 = vld [vmem:[#allocation2 + $0x118] sm:$0xff] }
  0x58   : > { %2080 = vmatprep.mubr.msk.bf16.mxu0 %vm829_vm0, %v2331_v40  ;;  %2096 = vmatprep.mubr.msk.bf16.mxu1 %vm829_vm0, %v2333_v41 }
  0x5f   : > { %1014 = vmatmul.mubr.bf16.gmra.mrb[24].mxu0 %v2335_v42  ;;  %1142 = vmatmul.mubr.bf16.gmra.mrb[24].mxu1 %v2336_v43 }
  0x60   : > { %2081 = vmatprep.mubr.msk.bf16.mxu0 %vm829_vm0, %v2337_v44  ;;  %2097 = vmatprep.mubr.msk.bf16.mxu1 %vm829_vm0, %v2339_v45 }
  0x67   : > { %1022 = vmatmul.mubr.bf16.gmra.mrb[28].mxu0 %v2341_v46  ;;  %1150 = vmatmul.mubr.bf16.gmra.mrb[28].mxu1 %v2342_v47 }
  0x68   : > { %2082 = vmatprep.mubr.msk.bf16.mxu0 %vm829_vm0, %v2343_v48  ;;  %2098 = vmatprep.mubr.msk.bf16.mxu1 %vm829_vm0, %v2345_v49 }
  0x6f   : > { %1030 = vmatmul.mubr.bf16.gmra.mrb[32].mxu0 %v2347_v50  ;;  %1158 = vmatmul.mubr.bf16.gmra.mrb[32].mxu1 %v2348_v51 }
  0x70   : > { %2083 = vmatprep.mubr.msk.bf16.mxu0 %vm829_vm0, %v2349_v52  ;;  %2099 = vmatprep.mubr.msk.bf16.mxu1 %vm829_vm0, %v2351_v53 }
  0x77   : > { %1038 = vmatmul.mubr.bf16.gmra.mrb[36].mxu0 %v2353_v54  ;;  %1166 = vmatmul.mubr.bf16.gmra.mrb[36].mxu1 %v2354_v55 }
  0x78   : > { %2084 = vmatprep.mubr.msk.bf16.mxu0 %vm829_vm0, %v2355_v56  ;;  %2100 = vmatprep.mubr.msk.bf16.mxu1 %vm829_vm0, %v2357_v57 }
  0x7f   : > { %1046 = vmatmul.mubr.bf16.gmra.mrb[40].mxu0 %v2359_v58  ;;  %1174 = vmatmul.mubr.bf16.gmra.mrb[40].mxu1 %v2360_v59  ;;  %v341_v59 = vld [vmem:[#allocation2 + $0x20] sm:$0xff] }
  0x80   : > { %2085 = vmatprep.mubr.msk.bf16.mxu0 %vm829_vm0, %v2361_v60  ;;  %2101 = vmatprep.mubr.msk.bf16.mxu1 %vm829_vm0, %v2363_v61  ;;  %v373_v60 = vld [vmem:[#allocation2 + $0x120] sm:$0xff] }
  0x87   : > { %1054 = vmatmul.mubr.bf16.gmra.mrb[44].mxu0 %v2365_v62  ;;  %1182 = vmatmul.mubr.bf16.gmra.mrb[44].mxu1 %v2366_v63 }
  0x88   : > { %2086 = vmatprep.mubr.msk.bf16.mxu0 %vm829_vm0, %v2367_v0  ;;  %2102 = vmatprep.mubr.msk.bf16.mxu1 %vm829_vm0, %v2369_v1 }
  0x8f   : > { %1062 = vmatmul.mubr.bf16.gmra.mrb[48].mxu0 %v2371_v2  ;;  %1190 = vmatmul.mubr.bf16.gmra.mrb[48].mxu1 %v2372_v3  ;;  %v342_v3 = vld [vmem:[#allocation2 + $0x28] sm:$0xff] }
  0x90   : > { %2087 = vmatprep.mubr.msk.bf16.mxu0 %vm829_vm0, %v2373_v4  ;;  %2103 = vmatprep.mubr.msk.bf16.mxu1 %vm829_vm0, %v2375_v5  ;;  %v374_v4 = vld [vmem:[#allocation2 + $0x128] sm:$0xff] }
  0x97   : > { %1070 = vmatmul.mubr.bf16.gmra.mrb[52].mxu0 %v2377_v6  ;;  %1198 = vmatmul.mubr.bf16.gmra.mrb[52].mxu1 %v2378_v7 }
  0x98   : > { %2088 = vmatprep.mubr.msk.bf16.mxu0 %vm829_vm0, %v2379_v8  ;;  %2104 = vmatprep.mubr.msk.bf16.mxu1 %vm829_vm0, %v2381_v9 }
  0x9f   : > { %1078 = vmatmul.mubr.bf16.gmra.mrb[56].mxu0 %v2383_v10  ;;  %1206 = vmatmul.mubr.bf16.gmra.mrb[56].mxu1 %v2384_v11 }
  0xa0   : > { %2089 = vmatprep.mubr.msk.bf16.mxu0 %vm829_vm0, %v2385_v12  ;;  %2105 = vmatprep.mubr.msk.bf16.mxu1 %vm829_vm0, %v2387_v13 }
  0xa7   : > { %1086 = vmatmul.mubr.bf16.gmra.mrb[60].mxu0 %v2389_v14  ;;  %1214 = vmatmul.mubr.bf16.gmra.mrb[60].mxu1 %v2390_v15 }
 0x102   : > { %v967_v18 = vpop.f32.mrb[0].mxu0  ;;  %v1095_v19 = vpop.f32.mrb[0].mxu1 }
 0x103   : > { %v1222_v22 = vadd.f32 %v967_v18, %v337_v16  ;;  %v1254_v23 = vadd.f32 %v1095_v19, %v369_v17  ;;  %v969_v24 = vpop.f32.mrb[1].mxu0  ;;  %v1097_v25 = vpop.f32.mrb[1].mxu1 }
 0x104   : > { %v970_v26 = vpop.f32.mrb[2].mxu0  ;;  %v1098_v27 = vpop.f32.mrb[2].mxu1 }
 0x105   : > { %1287 = vst.msk [vmem:[#allocation2] sm:$0xff] %vm272_vm3, %v1222_v22  ;;  %1319 = vst.msk [vmem:[#allocation2 + $0x100] sm:$0xff] %vm272_vm3, %v1254_v23  ;;  %v1223_v28 = vadd.f32 %v970_v26, %v338_v20  ;;  %v1255_v29 = vadd.f32 %v1098_v27, %v370_v21  ;;  %v972_v30 = vpop.f32.mrb[3].mxu0  ;;  %v1100_v31 = vpop.f32.mrb[3].mxu1  ;;  %v343_v27 = vld [vmem:[#allocation2 + $0x30] sm:$0xff] }
 0x107   : > { %1288 = vst.msk [vmem:[#allocation2 + $0x8] sm:$0xff] %vm272_vm3, %v1223_v28  ;;  %1320 = vst.msk [vmem:[#allocation2 + $0x108] sm:$0xff] %vm272_vm3, %v1255_v29  ;;  %v375_v28 = vld [vmem:[#allocation2 + $0x130] sm:$0xff] }
 0x10a   : > { %v975_v35 = vpop.f32.mrb[4].mxu0  ;;  %v1103_v36 = vpop.f32.mrb[4].mxu1 }
 0x10b   : > { %v1224_v39 = vadd.f32 %v975_v35, %v339_v32  ;;  %v1256_v40 = vadd.f32 %v1103_v36, %v371_v33  ;;  %v977_v41 = vpop.f32.mrb[5].mxu0  ;;  %v1105_v42 = vpop.f32.mrb[5].mxu1  ;;  %v344_v36 = vld [vmem:[#allocation2 + $0x38] sm:$0xff] }
 0x10c   : > { %v1354_v43 = vld [vmem:[#allocation2] sm:$0xff]  ;;  %v978_v45 = vpop.f32.mrb[6].mxu0  ;;  %v1106_v46 = vpop.f32.mrb[6].mxu1 }
 0x10d   : > { %v1386_v44 = vld [vmem:[#allocation2 + $0x100] sm:$0xff]  ;;  %v1425_v47 = vadd.f32 %v2750_v34, %v1354_v43  ;;  %1289 = vst.msk [vmem:[#allocation2 + $0x10] sm:$0xff] %vm272_vm3, %v1224_v39  ;;  %1321 = vst.msk [vmem:[#allocation2 + $0x110] sm:$0xff] %vm272_vm3, %v1256_v40  ;;  %v1225_v49 = vadd.f32 %v978_v45, %v340_v37  ;;  %v1257_v50 = vadd.f32 %v1106_v46, %v372_v38  ;;  %v980_v51 = vpop.f32.mrb[7].mxu0  ;;  %v1108_v52 = vpop.f32.mrb[7].mxu1  ;;  %v376_v37 = vld [vmem:[#allocation2 + $0x138] sm:$0xff] }
 0x10e   : > { %v1457_v48 = vadd.f32 %v2750_v34, %v1386_v44  ;;  %v1355_v53 = vld [vmem:[#allocation2 + $0x8] sm:$0xff] }
 0x10f   : > { %v1387_v54 = vld [vmem:[#allocation2 + $0x108] sm:$0xff]  ;;  %v1489_v55 = vmax.f32 %v1425_v47, 0.0  ;;  %v1426_v57 = vadd.f32 %v2750_v34, %v1355_v53  ;;  %1290 = vst.msk [vmem:[#allocation2 + $0x18] sm:$0xff] %vm272_vm3, %v1225_v49  ;;  %1322 = vst.msk [vmem:[#allocation2 + $0x118] sm:$0xff] %vm272_vm3, %v1257_v50 }
 0x110   : > { %v1521_v56 = vmax.f32 %v1457_v48, 0.0  ;;  %v1458_v58 = vadd.f32 %v2750_v34, %v1387_v54 }
 0x111   : > { %v2174_v61 = vpack.c.bf16 %v1489_v55, %v1489_v55  ;;  %v1490_v63 = vmax.f32 %v1426_v57, 0.0 }
 0x112   : > { %v2206_v62 = vpack.c.bf16 %v1521_v56, %v1521_v56  ;;  %v1522_v0 = vmax.f32 %v1458_v58, 0.0  ;;  %v983_v1 = vpop.f32.mrb[8].mxu0  ;;  %v1111_v2 = vpop.f32.mrb[8].mxu1 }
 0x113   : > { %1810 = vst.msk [vmem:[%s2764_s22] sm:$0xf] %vm1809_vm4, %v2174_v61  ;;  %v2175_v5 = vpack.c.bf16 %v1490_v63, %v1490_v63  ;;  %v1226_v7 = vadd.f32 %v983_v1, %v341_v59  ;;  %v1258_v8 = vadd.f32 %v1111_v2, %v373_v60  ;;  %v985_v9 = vpop.f32.mrb[9].mxu0  ;;  %v1113_v10 = vpop.f32.mrb[9].mxu1  ;;  %v345_v60 = vld [vmem:[#allocation2 + $0x40] sm:$0xff] }
 0x114   : > { %1842 = vst.msk [vmem:[%s2764_s22 + $0x80] sm:$0xf] %vm1809_vm4, %v2206_v62  ;;  %v2207_v6 = vpack.c.bf16 %v1522_v0, %v1522_v0  ;;  %v1356_v11 = vld [vmem:[#allocation2 + $0x10] sm:$0xff]  ;;  %v986_v13 = vpop.f32.mrb[10].mxu0  ;;  %v1114_v14 = vpop.f32.mrb[10].mxu1  ;;  %v377_v61 = vld [vmem:[#allocation2 + $0x140] sm:$0xff] }
 0x115   : > { %v1388_v12 = vld [vmem:[#allocation2 + $0x110] sm:$0xff]  ;;  %1811 = vst.msk [vmem:[%s2764_s22 + $0x4] sm:$0xf] %vm1809_vm4, %v2175_v5  ;;  %v1427_v15 = vadd.f32 %v2750_v34, %v1356_v11  ;;  %v1227_v17 = vadd.f32 %v986_v13, %v342_v3  ;;  %v1259_v18 = vadd.f32 %v1114_v14, %v374_v4  ;;  %v988_v19 = vpop.f32.mrb[11].mxu0  ;;  %v1116_v20 = vpop.f32.mrb[11].mxu1  ;;  %v346_v4 = vld [vmem:[#allocation2 + $0x48] sm:$0xff] }
 0x116   : > { %1843 = vst.msk [vmem:[%s2764_s22 + $0x84] sm:$0xf] %vm1809_vm4, %v2207_v6  ;;  %v1459_v16 = vadd.f32 %v2750_v34, %v1388_v12  ;;  %v1357_v21 = vld [vmem:[#allocation2 + $0x18] sm:$0xff]  ;;  %v378_v5 = vld [vmem:[#allocation2 + $0x148] sm:$0xff] }
 0x117   : > { %1291 = vst.msk [vmem:[#allocation2 + $0x20] sm:$0xff] %vm272_vm3, %v1226_v7  ;;  %1323 = vst.msk [vmem:[#allocation2 + $0x120] sm:$0xff] %vm272_vm3, %v1258_v8  ;;  %v1389_v22 = vld [vmem:[#allocation2 + $0x118] sm:$0xff]  ;;  %v1491_v23 = vmax.f32 %v1427_v15, 0.0  ;;  %v1428_v25 = vadd.f32 %v2750_v34, %v1357_v21 }
 0x118   : > { %v1523_v24 = vmax.f32 %v1459_v16, 0.0  ;;  %v1460_v26 = vadd.f32 %v2750_v34, %v1389_v22  ;;  %1292 = vst.msk [vmem:[#allocation2 + $0x28] sm:$0xff] %vm272_vm3, %v1227_v17  ;;  %1324 = vst.msk [vmem:[#allocation2 + $0x128] sm:$0xff] %vm272_vm3, %v1259_v18 }
 0x119   : > { %v2176_v29 = vpack.c.bf16 %v1491_v23, %v1491_v23  ;;  %v1492_v31 = vmax.f32 %v1428_v25, 0.0 }
 0x11a   : > { %v2208_v30 = vpack.c.bf16 %v1523_v24, %v1523_v24  ;;  %v1524_v32 = vmax.f32 %v1460_v26, 0.0  ;;  %v991_v33 = vpop.f32.mrb[12].mxu0  ;;  %v1119_v35 = vpop.f32.mrb[12].mxu1 }
 0x11b   : > { %1812 = vst.msk [vmem:[%s2764_s22 + $0x8] sm:$0xf] %vm1809_vm4, %v2176_v29  ;;  %v2177_v38 = vpack.c.bf16 %v1492_v31, %v1492_v31  ;;  %v1228_v40 = vadd.f32 %v991_v33, %v343_v27  ;;  %v1260_v41 = vadd.f32 %v1119_v35, %v375_v28  ;;  %v993_v42 = vpop.f32.mrb[13].mxu0  ;;  %v1121_v43 = vpop.f32.mrb[13].mxu1  ;;  %v347_v28 = vld [vmem:[#allocation2 + $0x50] sm:$0xff] }
 0x11c   : > { %1844 = vst.msk [vmem:[%s2764_s22 + $0x88] sm:$0xf] %vm1809_vm4, %v2208_v30  ;;  %v2209_v39 = vpack.c.bf16 %v1524_v32, %v1524_v32  ;;  %v994_v46 = vpop.f32.mrb[14].mxu0  ;;  %v1122_v47 = vpop.f32.mrb[14].mxu1  ;;  %v379_v29 = vld [vmem:[#allocation2 + $0x150] sm:$0xff] }
 0x11d   : > { %1813 = vst.msk [vmem:[%s2764_s22 + $0xc] sm:$0xf] %vm1809_vm4, %v2177_v38  ;;  %v1229_v50 = vadd.f32 %v994_v46, %v344_v36  ;;  %v1261_v51 = vadd.f32 %v1122_v47, %v376_v37  ;;  %v996_v52 = vpop.f32.mrb[15].mxu0  ;;  %v1124_v53 = vpop.f32.mrb[15].mxu1  ;;  %v348_v37 = vld [vmem:[#allocation2 + $0x58] sm:$0xff] }
 0x11e   : > { %v1358_v44 = vld [vmem:[#allocation2 + $0x20] sm:$0xff]  ;;  %1845 = vst.msk [vmem:[%s2764_s22 + $0x8c] sm:$0xf] %vm1809_vm4, %v2209_v39  ;;  %v380_v38 = vld [vmem:[#allocation2 + $0x158] sm:$0xff] }
 0x11f   : > { %v1390_v45 = vld [vmem:[#allocation2 + $0x120] sm:$0xff]  ;;  %v1429_v48 = vadd.f32 %v2750_v34, %v1358_v44  ;;  %1293 = vst.msk [vmem:[#allocation2 + $0x30] sm:$0xff] %vm272_vm3, %v1228_v40  ;;  %1325 = vst.msk [vmem:[#allocation2 + $0x130] sm:$0xff] %vm272_vm3, %v1260_v41  ;;  %v1359_v54 = vld [vmem:[#allocation2 + $0x28] sm:$0xff] }
 0x120   : > { %v1461_v49 = vadd.f32 %v2750_v34, %v1390_v45  ;;  %v1391_v55 = vld [vmem:[#allocation2 + $0x128] sm:$0xff]  ;;  %v1430_v58 = vadd.f32 %v2750_v34, %v1359_v54  ;;  %1294 = vst.msk [vmem:[#allocation2 + $0x38] sm:$0xff] %vm272_vm3, %v1229_v50  ;;  %1326 = vst.msk [vmem:[#allocation2 + $0x138] sm:$0xff] %vm272_vm3, %v1261_v51 }
 0x121   : > { %v1493_v56 = vmax.f32 %v1429_v48, 0.0  ;;  %v1462_v59 = vadd.f32 %v2750_v34, %v1391_v55 }
 0x122   : > { %v1525_v57 = vmax.f32 %v1461_v49, 0.0  ;;  %v1494_v0 = vmax.f32 %v1430_v58, 0.0  ;;  %v999_v2 = vpop.f32.mrb[16].mxu0  ;;  %v1127_v3 = vpop.f32.mrb[16].mxu1 }
 0x123   : > { %v2178_v62 = vpack.c.bf16 %v1493_v56, %v1493_v56  ;;  %v1526_v1 = vmax.f32 %v1462_v59, 0.0  ;;  %v1230_v8 = vadd.f32 %v999_v2, %v345_v60  ;;  %v1262_v9 = vadd.f32 %v1127_v3, %v377_v61  ;;  %v1001_v10 = vpop.f32.mrb[17].mxu0  ;;  %v1129_v11 = vpop.f32.mrb[17].mxu1  ;;  %v349_v61 = vld [vmem:[#allocation2 + $0x60] sm:$0xff] }
 0x124   : > { %v2210_v63 = vpack.c.bf16 %v1525_v57, %v1525_v57  ;;  %v2179_v6 = vpack.c.bf16 %v1494_v0, %v1494_v0  ;;  %v1002_v14 = vpop.f32.mrb[18].mxu0  ;;  %v1130_v15 = vpop.f32.mrb[18].mxu1 }
 0x125   : > { %1814 = vst.msk [vmem:[%s2764_s22 + $0x10] sm:$0xf] %vm1809_vm4, %v2178_v62  ;;  %v2211_v7 = vpack.c.bf16 %v1526_v1, %v1526_v1  ;;  %v1231_v18 = vadd.f32 %v1002_v14, %v346_v4  ;;  %v1263_v19 = vadd.f32 %v1130_v15, %v378_v5  ;;  %v1004_v20 = vpop.f32.mrb[19].mxu0  ;;  %v1132_v21 = vpop.f32.mrb[19].mxu1  ;;  %v381_v62 = vld [vmem:[#allocation2 + $0x160] sm:$0xff]  ;;  %v350_v5 = vld [vmem:[#allocation2 + $0x68] sm:$0xff] }
 0x126   : > { %1846 = vst.msk [vmem:[%s2764_s22 + $0x90] sm:$0xf] %vm1809_vm4, %v2210_v63  ;;  %v1360_v12 = vld [vmem:[#allocation2 + $0x30] sm:$0xff]  ;;  %1815 = vst.msk [vmem:[%s2764_s22 + $0x14] sm:$0xf] %vm1809_vm4, %v2179_v6  ;;  %v382_v6 = vld [vmem:[#allocation2 + $0x168] sm:$0xff] }
 0x127   : > { %v1392_v13 = vld [vmem:[#allocation2 + $0x130] sm:$0xff]  ;;  %1847 = vst.msk [vmem:[%s2764_s22 + $0x94] sm:$0xf] %vm1809_vm4, %v2211_v7  ;;  %v1431_v16 = vadd.f32 %v2750_v34, %v1360_v12  ;;  %v1361_v22 = vld [vmem:[#allocation2 + $0x38] sm:$0xff] }
 0x128   : > { %v1463_v17 = vadd.f32 %v2750_v34, %v1392_v13  ;;  %1295 = vst.msk [vmem:[#allocation2 + $0x40] sm:$0xff] %vm272_vm3, %v1230_v8  ;;  %1327 = vst.msk [vmem:[#allocation2 + $0x140] sm:$0xff] %vm272_vm3, %v1262_v9  ;;  %v1393_v23 = vld [vmem:[#allocation2 + $0x138] sm:$0xff]  ;;  %v1432_v26 = vadd.f32 %v2750_v34, %v1361_v22 }
 0x129   : > { %v1495_v24 = vmax.f32 %v1431_v16, 0.0  ;;  %v1464_v27 = vadd.f32 %v2750_v34, %v1393_v23  ;;  %1296 = vst.msk [vmem:[#allocation2 + $0x48] sm:$0xff] %vm272_vm3, %v1231_v18  ;;  %1328 = vst.msk [vmem:[#allocation2 + $0x148] sm:$0xff] %vm272_vm3, %v1263_v19 }
 0x12a   : > { %v1527_v25 = vmax.f32 %v1463_v17, 0.0  ;;  %v1496_v32 = vmax.f32 %v1432_v26, 0.0  ;;  %v1007_v35 = vpop.f32.mrb[20].mxu0  ;;  %v1135_v36 = vpop.f32.mrb[20].mxu1 }
 0x12b   : > { %v2180_v30 = vpack.c.bf16 %v1495_v24, %v1495_v24  ;;  %v1528_v33 = vmax.f32 %v1464_v27, 0.0  ;;  %v1232_v41 = vadd.f32 %v1007_v35, %v347_v28  ;;  %v1264_v42 = vadd.f32 %v1135_v36, %v379_v29  ;;  %v1009_v43 = vpop.f32.mrb[21].mxu0  ;;  %v1137_v44 = vpop.f32.mrb[21].mxu1  ;;  %v351_v29 = vld [vmem:[#allocation2 + $0x70] sm:$0xff] }
 0x12c   : > { %v2212_v31 = vpack.c.bf16 %v1527_v25, %v1527_v25  ;;  %v2181_v39 = vpack.c.bf16 %v1496_v32, %v1496_v32  ;;  %v1010_v47 = vpop.f32.mrb[22].mxu0  ;;  %v1138_v48 = vpop.f32.mrb[22].mxu1 }
 0x12d   : > { %1816 = vst.msk [vmem:[%s2764_s22 + $0x18] sm:$0xf] %vm1809_vm4, %v2180_v30  ;;  %v2213_v40 = vpack.c.bf16 %v1528_v33, %v1528_v33  ;;  %v1233_v51 = vadd.f32 %v1010_v47, %v348_v37  ;;  %v1265_v52 = vadd.f32 %v1138_v48, %v380_v38  ;;  %v1012_v53 = vpop.f32.mrb[23].mxu0  ;;  %v1140_v54 = vpop.f32.mrb[23].mxu1  ;;  %v383_v30 = vld [vmem:[#allocation2 + $0x170] sm:$0xff]  ;;  %v352_v38 = vld [vmem:[#allocation2 + $0x78] sm:$0xff] }
 0x12e   : > { %1848 = vst.msk [vmem:[%s2764_s22 + $0x98] sm:$0xf] %vm1809_vm4, %v2212_v31  ;;  %1817 = vst.msk [vmem:[%s2764_s22 + $0x1c] sm:$0xf] %vm1809_vm4, %v2181_v39  ;;  %v384_v39 = vld [vmem:[#allocation2 + $0x178] sm:$0xff] }
 0x12f   : > { %v1362_v45 = vld [vmem:[#allocation2 + $0x40] sm:$0xff]  ;;  %1849 = vst.msk [vmem:[%s2764_s22 + $0x9c] sm:$0xf] %vm1809_vm4, %v2213_v40 }
 0x130   : > { %v1394_v46 = vld [vmem:[#allocation2 + $0x140] sm:$0xff]  ;;  %v1433_v49 = vadd.f32 %v2750_v34, %v1362_v45  ;;  %1297 = vst.msk [vmem:[#allocation2 + $0x50] sm:$0xff] %vm272_vm3, %v1232_v41  ;;  %1329 = vst.msk [vmem:[#allocation2 + $0x150] sm:$0xff] %vm272_vm3, %v1264_v42  ;;  %v1363_v55 = vld [vmem:[#allocation2 + $0x48] sm:$0xff] }
 0x131   : > { %v1465_v50 = vadd.f32 %v2750_v34, %v1394_v46  ;;  %v1395_v56 = vld [vmem:[#allocation2 + $0x148] sm:$0xff]  ;;  %v1434_v59 = vadd.f32 %v2750_v34, %v1363_v55  ;;  %1298 = vst.msk [vmem:[#allocation2 + $0x58] sm:$0xff] %vm272_vm3, %v1233_v51  ;;  %1330 = vst.msk [vmem:[#allocation2 + $0x158] sm:$0xff] %vm272_vm3, %v1265_v52 }
 0x132   : > { %v1497_v57 = vmax.f32 %v1433_v49, 0.0  ;;  %v1466_v60 = vadd.f32 %v2750_v34, %v1395_v56  ;;  %v1015_v3 = vpop.f32.mrb[24].mxu0  ;;  %v1143_v4 = vpop.f32.mrb[24].mxu1 }
 0x133   : > { %v1529_v58 = vmax.f32 %v1465_v50, 0.0  ;;  %v1498_v1 = vmax.f32 %v1434_v59, 0.0  ;;  %v1234_v9 = vadd.f32 %v1015_v3, %v349_v61  ;;  %v1266_v10 = vadd.f32 %v1143_v4, %v381_v62  ;;  %v1017_v11 = vpop.f32.mrb[25].mxu0  ;;  %v1145_v12 = vpop.f32.mrb[25].mxu1  ;;  %v353_v62 = vld [vmem:[#allocation2 + $0x80] sm:$0xff] }
 0x134   : > { %v2182_v63 = vpack.c.bf16 %v1497_v57, %v1497_v57  ;;  %v1530_v2 = vmax.f32 %v1466_v60, 0.0  ;;  %v1018_v15 = vpop.f32.mrb[26].mxu0  ;;  %v1146_v16 = vpop.f32.mrb[26].mxu1 }
 0x135   : > { %v2214_v0 = vpack.c.bf16 %v1529_v58, %v1529_v58  ;;  %v2183_v7 = vpack.c.bf16 %v1498_v1, %v1498_v1  ;;  %1299 = vst.msk [vmem:[#allocation2 + $0x60] sm:$0xff] %vm272_vm3, %v1234_v9  ;;  %1331 = vst.msk [vmem:[#allocation2 + $0x160] sm:$0xff] %vm272_vm3, %v1266_v10  ;;  %v1235_v19 = vadd.f32 %v1018_v15, %v350_v5  ;;  %v1020_v21 = vpop.f32.mrb[27].mxu0  ;;  %v1148_v22 = vpop.f32.mrb[27].mxu1 }
 0x136   : > { %1818 = vst.msk [vmem:[%s2764_s22 + $0x20] sm:$0xf] %vm1809_vm4, %v2182_v63  ;;  %v2215_v8 = vpack.c.bf16 %v1530_v2, %v1530_v2  ;;  %v1267_v20 = vadd.f32 %v1146_v16, %v382_v6  ;;  %v385_v63 = vld [vmem:[#allocation2 + $0x180] sm:$0xff]  ;;  %v354_v6 = vld [vmem:[#allocation2 + $0x88] sm:$0xff] }
 0x137   : > { %1850 = vst.msk [vmem:[%s2764_s22 + $0xa0] sm:$0xf] %vm1809_vm4, %v2214_v0  ;;  %v1364_v13 = vld [vmem:[#allocation2 + $0x50] sm:$0xff]  ;;  %1819 = vst.msk [vmem:[%s2764_s22 + $0x24] sm:$0xf] %vm1809_vm4, %v2183_v7  ;;  %v386_v7 = vld [vmem:[#allocation2 + $0x188] sm:$0xff] }
 0x138   : > { %v1396_v14 = vld [vmem:[#allocation2 + $0x150] sm:$0xff]  ;;  %1851 = vst.msk [vmem:[%s2764_s22 + $0xa4] sm:$0xf] %vm1809_vm4, %v2215_v8  ;;  %v1435_v17 = vadd.f32 %v2750_v34, %v1364_v13  ;;  %v1365_v23 = vld [vmem:[#allocation2 + $0x58] sm:$0xff] }
 0x139   : > { %v1467_v18 = vadd.f32 %v2750_v34, %v1396_v14  ;;  %v1397_v24 = vld [vmem:[#allocation2 + $0x158] sm:$0xff]  ;;  %v1436_v27 = vadd.f32 %v2750_v34, %v1365_v23  ;;  %1300 = vst.msk [vmem:[#allocation2 + $0x68] sm:$0xff] %vm272_vm3, %v1235_v19  ;;  %1332 = vst.msk [vmem:[#allocation2 + $0x168] sm:$0xff] %vm272_vm3, %v1267_v20 }
 0x13a   : > { %v1499_v25 = vmax.f32 %v1435_v17, 0.0  ;;  %v1468_v28 = vadd.f32 %v2750_v34, %v1397_v24  ;;  %v1023_v36 = vpop.f32.mrb[28].mxu0  ;;  %v1151_v37 = vpop.f32.mrb[28].mxu1 }
 0x13b   : > { %v1531_v26 = vmax.f32 %v1467_v18, 0.0  ;;  %v1500_v33 = vmax.f32 %v1436_v27, 0.0  ;;  %v1236_v42 = vadd.f32 %v1023_v36, %v351_v29  ;;  %v1268_v43 = vadd.f32 %v1151_v37, %v383_v30  ;;  %v1025_v44 = vpop.f32.mrb[29].mxu0  ;;  %v1153_v45 = vpop.f32.mrb[29].mxu1  ;;  %v355_v30 = vld [vmem:[#allocation2 + $0x90] sm:$0xff] }
 0x13c   : > { %v2184_v31 = vpack.c.bf16 %v1499_v25, %v1499_v25  ;;  %v1532_v35 = vmax.f32 %v1468_v28, 0.0  ;;  %v1366_v46 = vld [vmem:[#allocation2 + $0x60] sm:$0xff]  ;;  %v1026_v48 = vpop.f32.mrb[30].mxu0  ;;  %v1154_v49 = vpop.f32.mrb[30].mxu1 }
 0x13d   : > { %v2216_v32 = vpack.c.bf16 %v1531_v26, %v1531_v26  ;;  %v2185_v40 = vpack.c.bf16 %v1500_v33, %v1500_v33  ;;  %v1398_v47 = vld [vmem:[#allocation2 + $0x160] sm:$0xff]  ;;  %v1437_v50 = vadd.f32 %v2750_v34, %v1366_v46  ;;  %1301 = vst.msk [vmem:[#allocation2 + $0x70] sm:$0xff] %vm272_vm3, %v1236_v42  ;;  %1333 = vst.msk [vmem:[#allocation2 + $0x170] sm:$0xff] %vm272_vm3, %v1268_v43  ;;  %v1028_v54 = vpop.f32.mrb[31].mxu0  ;;  %v1156_v55 = vpop.f32.mrb[31].mxu1 }
 0x13e   : > { %1820 = vst.msk [vmem:[%s2764_s22 + $0x28] sm:$0xf] %vm1809_vm4, %v2184_v31  ;;  %v2217_v41 = vpack.c.bf16 %v1532_v35, %v1532_v35  ;;  %v1469_v51 = vadd.f32 %v2750_v34, %v1398_v47  ;;  %v1237_v52 = vadd.f32 %v1026_v48, %v352_v38  ;;  %v1269_v53 = vadd.f32 %v1154_v49, %v384_v39  ;;  %v387_v31 = vld [vmem:[#allocation2 + $0x190] sm:$0xff]  ;;  %v356_v39 = vld [vmem:[#allocation2 + $0x98] sm:$0xff] }
 0x13f   : > { %1852 = vst.msk [vmem:[%s2764_s22 + $0xa8] sm:$0xf] %vm1809_vm4, %v2216_v32  ;;  %1821 = vst.msk [vmem:[%s2764_s22 + $0x2c] sm:$0xf] %vm1809_vm4, %v2185_v40  ;;  %v1501_v58 = vmax.f32 %v1437_v50, 0.0  ;;  %v388_v40 = vld [vmem:[#allocation2 + $0x198] sm:$0xff] }
 0x140   : > { %1853 = vst.msk [vmem:[%s2764_s22 + $0xac] sm:$0xf] %vm1809_vm4, %v2217_v41  ;;  %v1367_v56 = vld [vmem:[#allocation2 + $0x68] sm:$0xff]  ;;  %v1533_v59 = vmax.f32 %v1469_v51, 0.0 }
 0x141   : > { %v1399_v57 = vld [vmem:[#allocation2 + $0x168] sm:$0xff]  ;;  %v1438_v60 = vadd.f32 %v2750_v34, %v1367_v56  ;;  %1302 = vst.msk [vmem:[#allocation2 + $0x78] sm:$0xff] %vm272_vm3, %v1237_v52  ;;  %1334 = vst.msk [vmem:[#allocation2 + $0x178] sm:$0xff] %vm272_vm3, %v1269_v53  ;;  %v2186_v0 = vpack.c.bf16 %v1501_v58, %v1501_v58 }
 0x142   : > { %v1470_v61 = vadd.f32 %v2750_v34, %v1399_v57  ;;  %v2218_v1 = vpack.c.bf16 %v1533_v59, %v1533_v59  ;;  %v1031_v4 = vpop.f32.mrb[32].mxu0  ;;  %v1159_v5 = vpop.f32.mrb[32].mxu1 }
 0x143   : > { %v1502_v2 = vmax.f32 %v1438_v60, 0.0  ;;  %1822 = vst.msk [vmem:[%s2764_s22 + $0x30] sm:$0xf] %vm1809_vm4, %v2186_v0  ;;  %v1238_v10 = vadd.f32 %v1031_v4, %v353_v62  ;;  %v1270_v11 = vadd.f32 %v1159_v5, %v385_v63  ;;  %v1033_v12 = vpop.f32.mrb[33].mxu0  ;;  %v1161_v13 = vpop.f32.mrb[33].mxu1  ;;  %v357_v63 = vld [vmem:[#allocation2 + $0xa0] sm:$0xff] }
 0x144   : > { %v1534_v3 = vmax.f32 %v1470_v61, 0.0  ;;  %1854 = vst.msk [vmem:[%s2764_s22 + $0xb0] sm:$0xf] %vm1809_vm4, %v2218_v1  ;;  %v1368_v14 = vld [vmem:[#allocation2 + $0x70] sm:$0xff]  ;;  %v1034_v16 = vpop.f32.mrb[34].mxu0  ;;  %v1162_v17 = vpop.f32.mrb[34].mxu1 }
 0x145   : > { %v2187_v8 = vpack.c.bf16 %v1502_v2, %v1502_v2  ;;  %v1400_v15 = vld [vmem:[#allocation2 + $0x170] sm:$0xff]  ;;  %v1439_v18 = vadd.f32 %v2750_v34, %v1368_v14  ;;  %1303 = vst.msk [vmem:[#allocation2 + $0x80] sm:$0xff] %vm272_vm3, %v1238_v10  ;;  %1335 = vst.msk [vmem:[#allocation2 + $0x180] sm:$0xff] %vm272_vm3, %v1270_v11  ;;  %v1239_v20 = vadd.f32 %v1034_v16, %v354_v6  ;;  %v1036_v22 = vpop.f32.mrb[35].mxu0  ;;  %v1164_v23 = vpop.f32.mrb[35].mxu1  ;;  %v389_v0 = vld [vmem:[#allocation2 + $0x1a0] sm:$0xff] }
 0x146   : > { %v2219_v9 = vpack.c.bf16 %v1534_v3, %v1534_v3  ;;  %v1471_v19 = vadd.f32 %v2750_v34, %v1400_v15  ;;  %v1271_v21 = vadd.f32 %v1162_v17, %v386_v7  ;;  %v358_v7 = vld [vmem:[#allocation2 + $0xa8] sm:$0xff] }
 0x147   : > { %1823 = vst.msk [vmem:[%s2764_s22 + $0x34] sm:$0xf] %vm1809_vm4, %v2187_v8  ;;  %v1503_v26 = vmax.f32 %v1439_v18, 0.0  ;;  %v390_v8 = vld [vmem:[#allocation2 + $0x1a8] sm:$0xff] }
 0x148   : > { %1855 = vst.msk [vmem:[%s2764_s22 + $0xb4] sm:$0xf] %vm1809_vm4, %v2219_v9  ;;  %v1369_v24 = vld [vmem:[#allocation2 + $0x78] sm:$0xff]  ;;  %v1535_v27 = vmax.f32 %v1471_v19, 0.0 }
 0x149   : > { %v1401_v25 = vld [vmem:[#allocation2 + $0x178] sm:$0xff]  ;;  %v1440_v28 = vadd.f32 %v2750_v34, %v1369_v24  ;;  %1304 = vst.msk [vmem:[#allocation2 + $0x88] sm:$0xff] %vm272_vm3, %v1239_v20  ;;  %1336 = vst.msk [vmem:[#allocation2 + $0x188] sm:$0xff] %vm272_vm3, %v1271_v21  ;;  %v2188_v32 = vpack.c.bf16 %v1503_v26, %v1503_v26 }
 0x14a   : > { %v1472_v29 = vadd.f32 %v2750_v34, %v1401_v25  ;;  %v2220_v33 = vpack.c.bf16 %v1535_v27, %v1535_v27  ;;  %v1039_v37 = vpop.f32.mrb[36].mxu0  ;;  %v1167_v38 = vpop.f32.mrb[36].mxu1 }
 0x14b   : > { %v1504_v35 = vmax.f32 %v1440_v28, 0.0  ;;  %1824 = vst.msk [vmem:[%s2764_s22 + $0x38] sm:$0xf] %vm1809_vm4, %v2188_v32  ;;  %v1240_v43 = vadd.f32 %v1039_v37, %v355_v30  ;;  %v1272_v44 = vadd.f32 %v1167_v38, %v387_v31  ;;  %v1041_v45 = vpop.f32.mrb[37].mxu0  ;;  %v1169_v46 = vpop.f32.mrb[37].mxu1  ;;  %v359_v31 = vld [vmem:[#allocation2 + $0xb0] sm:$0xff] }
 0x14c   : > { %v1536_v36 = vmax.f32 %v1472_v29, 0.0  ;;  %1856 = vst.msk [vmem:[%s2764_s22 + $0xb8] sm:$0xf] %vm1809_vm4, %v2220_v33  ;;  %v1370_v47 = vld [vmem:[#allocation2 + $0x80] sm:$0xff]  ;;  %v1042_v49 = vpop.f32.mrb[38].mxu0  ;;  %v1170_v50 = vpop.f32.mrb[38].mxu1 }
 0x14d   : > { %v2189_v41 = vpack.c.bf16 %v1504_v35, %v1504_v35  ;;  %v1402_v48 = vld [vmem:[#allocation2 + $0x180] sm:$0xff]  ;;  %v1441_v51 = vadd.f32 %v2750_v34, %v1370_v47  ;;  %1305 = vst.msk [vmem:[#allocation2 + $0x90] sm:$0xff] %vm272_vm3, %v1240_v43  ;;  %1337 = vst.msk [vmem:[#allocation2 + $0x190] sm:$0xff] %vm272_vm3, %v1272_v44  ;;  %v1241_v53 = vadd.f32 %v1042_v49, %v356_v39  ;;  %v1044_v55 = vpop.f32.mrb[39].mxu0  ;;  %v1172_v56 = vpop.f32.mrb[39].mxu1  ;;  %v391_v32 = vld [vmem:[#allocation2 + $0x1b0] sm:$0xff] }
 0x14e   : > { %v2221_v42 = vpack.c.bf16 %v1536_v36, %v1536_v36  ;;  %v1473_v52 = vadd.f32 %v2750_v34, %v1402_v48  ;;  %v1273_v54 = vadd.f32 %v1170_v50, %v388_v40  ;;  %v360_v40 = vld [vmem:[#allocation2 + $0xb8] sm:$0xff] }
 0x14f   : > { %1825 = vst.msk [vmem:[%s2764_s22 + $0x3c] sm:$0xf] %vm1809_vm4, %v2189_v41  ;;  %v1505_v59 = vmax.f32 %v1441_v51, 0.0  ;;  %v392_v41 = vld [vmem:[#allocation2 + $0x1b8] sm:$0xff] }
 0x150   : > { %1857 = vst.msk [vmem:[%s2764_s22 + $0xbc] sm:$0xf] %vm1809_vm4, %v2221_v42  ;;  %v1371_v57 = vld [vmem:[#allocation2 + $0x88] sm:$0xff]  ;;  %v1537_v60 = vmax.f32 %v1473_v52, 0.0 }
 0x151   : > { %v1403_v58 = vld [vmem:[#allocation2 + $0x188] sm:$0xff]  ;;  %v1442_v61 = vadd.f32 %v2750_v34, %v1371_v57  ;;  %1306 = vst.msk [vmem:[#allocation2 + $0x98] sm:$0xff] %vm272_vm3, %v1241_v53  ;;  %1338 = vst.msk [vmem:[#allocation2 + $0x198] sm:$0xff] %vm272_vm3, %v1273_v54  ;;  %v2190_v1 = vpack.c.bf16 %v1505_v59, %v1505_v59 }
 0x152   : > { %v1474_v62 = vadd.f32 %v2750_v34, %v1403_v58  ;;  %v2222_v2 = vpack.c.bf16 %v1537_v60, %v1537_v60  ;;  %v1047_v5 = vpop.f32.mrb[40].mxu0  ;;  %v1175_v6 = vpop.f32.mrb[40].mxu1 }
 0x153   : > { %v1506_v3 = vmax.f32 %v1442_v61, 0.0  ;;  %1826 = vst.msk [vmem:[%s2764_s22 + $0x40] sm:$0xf] %vm1809_vm4, %v2190_v1  ;;  %v1242_v11 = vadd.f32 %v1047_v5, %v357_v63  ;;  %v1274_v12 = vadd.f32 %v1175_v6, %v389_v0  ;;  %v1049_v13 = vpop.f32.mrb[41].mxu0  ;;  %v1177_v14 = vpop.f32.mrb[41].mxu1  ;;  %v361_v0 = vld [vmem:[#allocation2 + $0xc0] sm:$0xff] }
 0x154   : > { %v1538_v4 = vmax.f32 %v1474_v62, 0.0  ;;  %1858 = vst.msk [vmem:[%s2764_s22 + $0xc0] sm:$0xf] %vm1809_vm4, %v2222_v2  ;;  %v1372_v15 = vld [vmem:[#allocation2 + $0x90] sm:$0xff]  ;;  %v1050_v17 = vpop.f32.mrb[42].mxu0  ;;  %v1178_v18 = vpop.f32.mrb[42].mxu1 }
 0x155   : > { %v2191_v9 = vpack.c.bf16 %v1506_v3, %v1506_v3  ;;  %v1404_v16 = vld [vmem:[#allocation2 + $0x190] sm:$0xff]  ;;  %v1443_v19 = vadd.f32 %v2750_v34, %v1372_v15  ;;  %1307 = vst.msk [vmem:[#allocation2 + $0xa0] sm:$0xff] %vm272_vm3, %v1242_v11  ;;  %1339 = vst.msk [vmem:[#allocation2 + $0x1a0] sm:$0xff] %vm272_vm3, %v1274_v12  ;;  %v1243_v21 = vadd.f32 %v1050_v17, %v358_v7  ;;  %v1052_v23 = vpop.f32.mrb[43].mxu0  ;;  %v1180_v24 = vpop.f32.mrb[43].mxu1  ;;  %v393_v1 = vld [vmem:[#allocation2 + $0x1c0] sm:$0xff] }
 0x156   : > { %v2223_v10 = vpack.c.bf16 %v1538_v4, %v1538_v4  ;;  %v1475_v20 = vadd.f32 %v2750_v34, %v1404_v16  ;;  %v1275_v22 = vadd.f32 %v1178_v18, %v390_v8  ;;  %v362_v8 = vld [vmem:[#allocation2 + $0xc8] sm:$0xff] }
 0x157   : > { %1827 = vst.msk [vmem:[%s2764_s22 + $0x44] sm:$0xf] %vm1809_vm4, %v2191_v9  ;;  %v1507_v27 = vmax.f32 %v1443_v19, 0.0  ;;  %v394_v9 = vld [vmem:[#allocation2 + $0x1c8] sm:$0xff] }
 0x158   : > { %1859 = vst.msk [vmem:[%s2764_s22 + $0xc4] sm:$0xf] %vm1809_vm4, %v2223_v10  ;;  %v1373_v25 = vld [vmem:[#allocation2 + $0x98] sm:$0xff]  ;;  %v1539_v28 = vmax.f32 %v1475_v20, 0.0 }
 0x159   : > { %v1405_v26 = vld [vmem:[#allocation2 + $0x198] sm:$0xff]  ;;  %v1444_v29 = vadd.f32 %v2750_v34, %v1373_v25  ;;  %1308 = vst.msk [vmem:[#allocation2 + $0xa8] sm:$0xff] %vm272_vm3, %v1243_v21  ;;  %1340 = vst.msk [vmem:[#allocation2 + $0x1a8] sm:$0xff] %vm272_vm3, %v1275_v22  ;;  %v2192_v33 = vpack.c.bf16 %v1507_v27, %v1507_v27 }
 0x15a   : > { %v1476_v30 = vadd.f32 %v2750_v34, %v1405_v26  ;;  %v2224_v35 = vpack.c.bf16 %v1539_v28, %v1539_v28  ;;  %v1055_v38 = vpop.f32.mrb[44].mxu0  ;;  %v1183_v39 = vpop.f32.mrb[44].mxu1 }
 0x15b   : > { %v1508_v36 = vmax.f32 %v1444_v29, 0.0  ;;  %1828 = vst.msk [vmem:[%s2764_s22 + $0x48] sm:$0xf] %vm1809_vm4, %v2192_v33  ;;  %v1244_v44 = vadd.f32 %v1055_v38, %v359_v31  ;;  %v1276_v45 = vadd.f32 %v1183_v39, %v391_v32  ;;  %v1057_v46 = vpop.f32.mrb[45].mxu0  ;;  %v1185_v47 = vpop.f32.mrb[45].mxu1  ;;  %v363_v32 = vld [vmem:[#allocation2 + $0xd0] sm:$0xff] }
 0x15c   : > { %v1540_v37 = vmax.f32 %v1476_v30, 0.0  ;;  %1860 = vst.msk [vmem:[%s2764_s22 + $0xc8] sm:$0xf] %vm1809_vm4, %v2224_v35  ;;  %v1374_v48 = vld [vmem:[#allocation2 + $0xa0] sm:$0xff]  ;;  %v1058_v50 = vpop.f32.mrb[46].mxu0  ;;  %v1186_v51 = vpop.f32.mrb[46].mxu1 }
 0x15d   : > { %v2193_v42 = vpack.c.bf16 %v1508_v36, %v1508_v36  ;;  %v1406_v49 = vld [vmem:[#allocation2 + $0x1a0] sm:$0xff]  ;;  %v1445_v52 = vadd.f32 %v2750_v34, %v1374_v48  ;;  %1309 = vst.msk [vmem:[#allocation2 + $0xb0] sm:$0xff] %vm272_vm3, %v1244_v44  ;;  %1341 = vst.msk [vmem:[#allocation2 + $0x1b0] sm:$0xff] %vm272_vm3, %v1276_v45  ;;  %v1245_v54 = vadd.f32 %v1058_v50, %v360_v40  ;;  %v1060_v56 = vpop.f32.mrb[47].mxu0  ;;  %v1188_v57 = vpop.f32.mrb[47].mxu1  ;;  %v395_v33 = vld [vmem:[#allocation2 + $0x1d0] sm:$0xff] }
 0x15e   : > { %v2225_v43 = vpack.c.bf16 %v1540_v37, %v1540_v37  ;;  %v1477_v53 = vadd.f32 %v2750_v34, %v1406_v49  ;;  %v1277_v55 = vadd.f32 %v1186_v51, %v392_v41  ;;  %v364_v41 = vld [vmem:[#allocation2 + $0xd8] sm:$0xff] }
 0x15f   : > { %1829 = vst.msk [vmem:[%s2764_s22 + $0x4c] sm:$0xf] %vm1809_vm4, %v2193_v42  ;;  %v1509_v60 = vmax.f32 %v1445_v52, 0.0  ;;  %v396_v42 = vld [vmem:[#allocation2 + $0x1d8] sm:$0xff] }
 0x160   : > { %1861 = vst.msk [vmem:[%s2764_s22 + $0xcc] sm:$0xf] %vm1809_vm4, %v2225_v43  ;;  %v1375_v58 = vld [vmem:[#allocation2 + $0xa8] sm:$0xff]  ;;  %v1541_v61 = vmax.f32 %v1477_v53, 0.0 }
 0x161   : > { %v1407_v59 = vld [vmem:[#allocation2 + $0x1a8] sm:$0xff]  ;;  %v1446_v62 = vadd.f32 %v2750_v34, %v1375_v58  ;;  %1310 = vst.msk [vmem:[#allocation2 + $0xb8] sm:$0xff] %vm272_vm3, %v1245_v54  ;;  %1342 = vst.msk [vmem:[#allocation2 + $0x1b8] sm:$0xff] %vm272_vm3, %v1277_v55  ;;  %v2194_v2 = vpack.c.bf16 %v1509_v60, %v1509_v60 }
 0x162   : > { %v1478_v63 = vadd.f32 %v2750_v34, %v1407_v59  ;;  %v2226_v3 = vpack.c.bf16 %v1541_v61, %v1541_v61  ;;  %v1063_v6 = vpop.f32.mrb[48].mxu0  ;;  %v1191_v7 = vpop.f32.mrb[48].mxu1 }
 0x163   : > { %v1510_v4 = vmax.f32 %v1446_v62, 0.0  ;;  %1830 = vst.msk [vmem:[%s2764_s22 + $0x50] sm:$0xf] %vm1809_vm4, %v2194_v2  ;;  %v1246_v12 = vadd.f32 %v1063_v6, %v361_v0  ;;  %v1278_v13 = vadd.f32 %v1191_v7, %v393_v1  ;;  %v1065_v14 = vpop.f32.mrb[49].mxu0  ;;  %v1193_v15 = vpop.f32.mrb[49].mxu1  ;;  %v365_v1 = vld [vmem:[#allocation2 + $0xe0] sm:$0xff] }
 0x164   : > { %v1542_v5 = vmax.f32 %v1478_v63, 0.0  ;;  %1862 = vst.msk [vmem:[%s2764_s22 + $0xd0] sm:$0xf] %vm1809_vm4, %v2226_v3  ;;  %v1376_v16 = vld [vmem:[#allocation2 + $0xb0] sm:$0xff]  ;;  %v1066_v18 = vpop.f32.mrb[50].mxu0  ;;  %v1194_v19 = vpop.f32.mrb[50].mxu1 }
 0x165   : > { %v2195_v10 = vpack.c.bf16 %v1510_v4, %v1510_v4  ;;  %v1408_v17 = vld [vmem:[#allocation2 + $0x1b0] sm:$0xff]  ;;  %v1447_v20 = vadd.f32 %v2750_v34, %v1376_v16  ;;  %1311 = vst.msk [vmem:[#allocation2 + $0xc0] sm:$0xff] %vm272_vm3, %v1246_v12  ;;  %1343 = vst.msk [vmem:[#allocation2 + $0x1c0] sm:$0xff] %vm272_vm3, %v1278_v13  ;;  %v1247_v22 = vadd.f32 %v1066_v18, %v362_v8  ;;  %v1068_v24 = vpop.f32.mrb[51].mxu0  ;;  %v1196_v25 = vpop.f32.mrb[51].mxu1  ;;  %v397_v2 = vld [vmem:[#allocation2 + $0x1e0] sm:$0xff] }
 0x166   : > { %v2227_v11 = vpack.c.bf16 %v1542_v5, %v1542_v5  ;;  %v1479_v21 = vadd.f32 %v2750_v34, %v1408_v17  ;;  %v1279_v23 = vadd.f32 %v1194_v19, %v394_v9  ;;  %v366_v9 = vld [vmem:[#allocation2 + $0xe8] sm:$0xff] }
 0x167   : > { %1831 = vst.msk [vmem:[%s2764_s22 + $0x54] sm:$0xf] %vm1809_vm4, %v2195_v10  ;;  %v1511_v28 = vmax.f32 %v1447_v20, 0.0  ;;  %v398_v10 = vld [vmem:[#allocation2 + $0x1e8] sm:$0xff]  ;;  %v2969_v20 = vld [vmem:[%s3026_s2] ss:$0 sm:$0xff] }
 0x168   : > { %1863 = vst.msk [vmem:[%s2764_s22 + $0xd4] sm:$0xf] %vm1809_vm4, %v2227_v11  ;;  %v1377_v26 = vld [vmem:[#allocation2 + $0xb8] sm:$0xff]  ;;  %v1543_v29 = vmax.f32 %v1479_v21, 0.0 }
 0x169   : > { %v1409_v27 = vld [vmem:[#allocation2 + $0x1b8] sm:$0xff]  ;;  %v1448_v30 = vadd.f32 %v2750_v34, %v1377_v26  ;;  %1312 = vst.msk [vmem:[#allocation2 + $0xc8] sm:$0xff] %vm272_vm3, %v1247_v22  ;;  %1344 = vst.msk [vmem:[#allocation2 + $0x1c8] sm:$0xff] %vm272_vm3, %v1279_v23  ;;  %v2196_v35 = vpack.c.bf16 %v1511_v28, %v1511_v28 }
 0x16a   : > { %v1480_v31 = vadd.f32 %v2750_v34, %v1409_v27  ;;  %v2228_v36 = vpack.c.bf16 %v1543_v29, %v1543_v29  ;;  %v1071_v39 = vpop.f32.mrb[52].mxu0  ;;  %v1199_v40 = vpop.f32.mrb[52].mxu1 }
 0x16b   : > { %v1512_v37 = vmax.f32 %v1448_v30, 0.0  ;;  %1832 = vst.msk [vmem:[%s2764_s22 + $0x58] sm:$0xf] %vm1809_vm4, %v2196_v35  ;;  %v1248_v45 = vadd.f32 %v1071_v39, %v363_v32  ;;  %v1280_v46 = vadd.f32 %v1199_v40, %v395_v33  ;;  %v1073_v47 = vpop.f32.mrb[53].mxu0  ;;  %v1201_v48 = vpop.f32.mrb[53].mxu1  ;;  %v367_v33 = vld [vmem:[#allocation2 + $0xf0] sm:$0xff] }
 0x16c   : > { %v1544_v38 = vmax.f32 %v1480_v31, 0.0  ;;  %1864 = vst.msk [vmem:[%s2764_s22 + $0xd8] sm:$0xf] %vm1809_vm4, %v2228_v36  ;;  %v1378_v49 = vld [vmem:[#allocation2 + $0xc0] sm:$0xff]  ;;  %v1074_v51 = vpop.f32.mrb[54].mxu0  ;;  %v1202_v52 = vpop.f32.mrb[54].mxu1 }
 0x16d   : > { %v2197_v43 = vpack.c.bf16 %v1512_v37, %v1512_v37  ;;  %v1410_v50 = vld [vmem:[#allocation2 + $0x1c0] sm:$0xff]  ;;  %v1449_v53 = vadd.f32 %v2750_v34, %v1378_v49  ;;  %1313 = vst.msk [vmem:[#allocation2 + $0xd0] sm:$0xff] %vm272_vm3, %v1248_v45  ;;  %1345 = vst.msk [vmem:[#allocation2 + $0x1d0] sm:$0xff] %vm272_vm3, %v1280_v46  ;;  %v1249_v55 = vadd.f32 %v1074_v51, %v364_v41  ;;  %v1076_v57 = vpop.f32.mrb[55].mxu0  ;;  %v1204_v58 = vpop.f32.mrb[55].mxu1  ;;  %v399_v35 = vld [vmem:[#allocation2 + $0x1f0] sm:$0xff] }
 0x16e   : > { %v2229_v44 = vpack.c.bf16 %v1544_v38, %v1544_v38  ;;  %v1481_v54 = vadd.f32 %v2750_v34, %v1410_v50  ;;  %v1281_v56 = vadd.f32 %v1202_v52, %v396_v42  ;;  %v368_v42 = vld [vmem:[#allocation2 + $0xf8] sm:$0xff] }
 0x16f   : > { %1833 = vst.msk [vmem:[%s2764_s22 + $0x5c] sm:$0xf] %vm1809_vm4, %v2197_v43  ;;  %v1513_v61 = vmax.f32 %v1449_v53, 0.0  ;;  %v400_v43 = vld [vmem:[#allocation2 + $0x1f8] sm:$0xff] }
 0x170   : > { %1865 = vst.msk [vmem:[%s2764_s22 + $0xdc] sm:$0xf] %vm1809_vm4, %v2229_v44  ;;  %v1379_v59 = vld [vmem:[#allocation2 + $0xc8] sm:$0xff]  ;;  %v1545_v62 = vmax.f32 %v1481_v54, 0.0 }
 0x171   : > { %v1411_v60 = vld [vmem:[#allocation2 + $0x1c8] sm:$0xff]  ;;  %v1450_v63 = vadd.f32 %v2750_v34, %v1379_v59  ;;  %1314 = vst.msk [vmem:[#allocation2 + $0xd8] sm:$0xff] %vm272_vm3, %v1249_v55  ;;  %1346 = vst.msk [vmem:[#allocation2 + $0x1d8] sm:$0xff] %vm272_vm3, %v1281_v56  ;;  %v2198_v3 = vpack.c.bf16 %v1513_v61, %v1513_v61 }
 0x172   : > { %v1482_v0 = vadd.f32 %v2750_v34, %v1411_v60  ;;  %v2230_v4 = vpack.c.bf16 %v1545_v62, %v1545_v62  ;;  %v1079_v7 = vpop.f32.mrb[56].mxu0  ;;  %v1207_v8 = vpop.f32.mrb[56].mxu1 }
 0x173   : > { %v1514_v5 = vmax.f32 %v1450_v63, 0.0  ;;  %1834 = vst.msk [vmem:[%s2764_s22 + $0x60] sm:$0xf] %vm1809_vm4, %v2198_v3  ;;  %v1250_v12 = vadd.f32 %v1079_v7, %v365_v1  ;;  %v1282_v13 = vadd.f32 %v1207_v8, %v397_v2  ;;  %v1081_v14 = vpop.f32.mrb[57].mxu0  ;;  %v1209_v15 = vpop.f32.mrb[57].mxu1 }
 0x174   : > { %v1546_v6 = vmax.f32 %v1482_v0, 0.0  ;;  %1866 = vst.msk [vmem:[%s2764_s22 + $0xe0] sm:$0xf] %vm1809_vm4, %v2230_v4  ;;  %v1380_v16 = vld [vmem:[#allocation2 + $0xd0] sm:$0xff]  ;;  %v1082_v18 = vpop.f32.mrb[58].mxu0  ;;  %v1210_v19 = vpop.f32.mrb[58].mxu1 }
 0x175   : > { %v2199_v34 = vpack.c.bf16 %v1514_v5, %v1514_v5  ;;  %v1412_v17 = vld [vmem:[#allocation2 + $0x1d0] sm:$0xff]  ;;  %v1451_v21 = vadd.f32 %v2969_v20, %v1380_v16  ;;  %1315 = vst.msk [vmem:[#allocation2 + $0xe0] sm:$0xff] %vm272_vm3, %v1250_v12  ;;  %1347 = vst.msk [vmem:[#allocation2 + $0x1e0] sm:$0xff] %vm272_vm3, %v1282_v13  ;;  %v1251_v23 = vadd.f32 %v1082_v18, %v366_v9  ;;  %v1084_v25 = vpop.f32.mrb[59].mxu0  ;;  %v1212_v26 = vpop.f32.mrb[59].mxu1 }
 0x176   : > { %v2231_v11 = vpack.c.bf16 %v1546_v6, %v1546_v6  ;;  %v1483_v22 = vadd.f32 %v2969_v20, %v1412_v17  ;;  %v1283_v24 = vadd.f32 %v1210_v19, %v398_v10 }
 0x177   : > { %1835 = vst.msk [vmem:[%s2764_s22 + $0x64] sm:$0xf] %vm1809_vm4, %v2199_v34  ;;  %v1515_v29 = vmax.f32 %v1451_v21, 0.0 }
 0x178   : > { %1867 = vst.msk [vmem:[%s2764_s22 + $0xe4] sm:$0xf] %vm1809_vm4, %v2231_v11  ;;  %v1381_v27 = vld [vmem:[#allocation2 + $0xd8] sm:$0xff]  ;;  %v1547_v30 = vmax.f32 %v1483_v22, 0.0 }
 0x179   : > { %v1413_v28 = vld [vmem:[#allocation2 + $0x1d8] sm:$0xff]  ;;  %v1452_v31 = vadd.f32 %v2969_v20, %v1381_v27  ;;  %1316 = vst.msk [vmem:[#allocation2 + $0xe8] sm:$0xff] %vm272_vm3, %v1251_v23  ;;  %1348 = vst.msk [vmem:[#allocation2 + $0x1e8] sm:$0xff] %vm272_vm3, %v1283_v24  ;;  %v2200_v36 = vpack.c.bf16 %v1515_v29, %v1515_v29 }
 0x17a   : > { %v1484_v32 = vadd.f32 %v2969_v20, %v1413_v28  ;;  %v2232_v37 = vpack.c.bf16 %v1547_v30, %v1547_v30  ;;  %v1087_v40 = vpop.f32.mrb[60].mxu0  ;;  %v1215_v41 = vpop.f32.mrb[60].mxu1 }
 0x17b   : > { %v1516_v38 = vmax.f32 %v1452_v31, 0.0  ;;  %1836 = vst.msk [vmem:[%s2764_s22 + $0x68] sm:$0xf] %vm1809_vm4, %v2200_v36  ;;  %v1252_v46 = vadd.f32 %v1087_v40, %v367_v33  ;;  %v1284_v47 = vadd.f32 %v1215_v41, %v399_v35  ;;  %v1089_v48 = vpop.f32.mrb[61].mxu0  ;;  %v1217_v49 = vpop.f32.mrb[61].mxu1 }
 0x17c   : > { %v1548_v39 = vmax.f32 %v1484_v32, 0.0  ;;  %1868 = vst.msk [vmem:[%s2764_s22 + $0xe8] sm:$0xf] %vm1809_vm4, %v2232_v37  ;;  %v1382_v50 = vld [vmem:[#allocation2 + $0xe0] sm:$0xff]  ;;  %v1090_v52 = vpop.f32.mrb[62].mxu0  ;;  %v1218_v53 = vpop.f32.mrb[62].mxu1 }
 0x17d   : > { %v2201_v44 = vpack.c.bf16 %v1516_v38, %v1516_v38  ;;  %v1414_v51 = vld [vmem:[#allocation2 + $0x1e0] sm:$0xff]  ;;  %v1453_v54 = vadd.f32 %v2969_v20, %v1382_v50  ;;  %1317 = vst.msk [vmem:[#allocation2 + $0xf0] sm:$0xff] %vm272_vm3, %v1252_v46  ;;  %1349 = vst.msk [vmem:[#allocation2 + $0x1f0] sm:$0xff] %vm272_vm3, %v1284_v47  ;;  %v1253_v56 = vadd.f32 %v1090_v52, %v368_v42  ;;  %v1092_v58 = vpop.f32.mrb[63].mxu0  ;;  %v1220_v59 = vpop.f32.mrb[63].mxu1 }
 0x17e   : > { %v2233_v45 = vpack.c.bf16 %v1548_v39, %v1548_v39  ;;  %v1485_v55 = vadd.f32 %v2969_v20, %v1414_v51  ;;  %v1285_v57 = vadd.f32 %v1218_v53, %v400_v43 }
 0x17f   : > { %1837 = vst.msk [vmem:[%s2764_s22 + $0x6c] sm:$0xf] %vm1809_vm4, %v2201_v44  ;;  %v1517_v62 = vmax.f32 %v1453_v54, 0.0 }
 0x180   : > { %1869 = vst.msk [vmem:[%s2764_s22 + $0xec] sm:$0xf] %vm1809_vm4, %v2233_v45  ;;  %v1383_v60 = vld [vmem:[#allocation2 + $0xe8] sm:$0xff]  ;;  %v1549_v63 = vmax.f32 %v1485_v55, 0.0 }
 0x181   : > { %v1415_v61 = vld [vmem:[#allocation2 + $0x1e8] sm:$0xff]  ;;  %v1454_v0 = vadd.f32 %v2969_v20, %v1383_v60  ;;  %1318 = vst.msk [vmem:[#allocation2 + $0xf8] sm:$0xff] %vm272_vm3, %v1253_v56  ;;  %1350 = vst.msk [vmem:[#allocation2 + $0x1f8] sm:$0xff] %vm272_vm3, %v1285_v57  ;;  %v2202_v2 = vpack.c.bf16 %v1517_v62, %v1517_v62 }
 0x182   : > { %v1486_v1 = vadd.f32 %v2969_v20, %v1415_v61  ;;  %v2234_v3 = vpack.c.bf16 %v1549_v63, %v1549_v63 }
 0x183   : > { %v1518_v4 = vmax.f32 %v1454_v0, 0.0  ;;  %1838 = vst.msk [vmem:[%s2764_s22 + $0x70] sm:$0xf] %vm1809_vm4, %v2202_v2 }
 0x184   : > { %v1550_v5 = vmax.f32 %v1486_v1, 0.0  ;;  %1870 = vst.msk [vmem:[%s2764_s22 + $0xf0] sm:$0xf] %vm1809_vm4, %v2234_v3  ;;  %v1384_v8 = vld [vmem:[#allocation2 + $0xf0] sm:$0xff] }
 0x185   : > { %v2203_v6 = vpack.c.bf16 %v1518_v4, %v1518_v4  ;;  %v1416_v9 = vld [vmem:[#allocation2 + $0x1f0] sm:$0xff]  ;;  %v1455_v10 = vadd.f32 %v2969_v20, %v1384_v8 }
 0x186   : > { %v2235_v7 = vpack.c.bf16 %v1550_v5, %v1550_v5  ;;  %v1487_v34 = vadd.f32 %v2969_v20, %v1416_v9 }
 0x187   : > { %1839 = vst.msk [vmem:[%s2764_s22 + $0x74] sm:$0xf] %vm1809_vm4, %v2203_v6  ;;  %v1519_v13 = vmax.f32 %v1455_v10, 0.0 }
 0x188   : > { %1871 = vst.msk [vmem:[%s2764_s22 + $0xf4] sm:$0xf] %vm1809_vm4, %v2235_v7  ;;  %v1385_v11 = vld [vmem:[#allocation2 + $0xf8] sm:$0xff]  ;;  %v1551_v14 = vmax.f32 %v1487_v34, 0.0 }
 0x189   : > { %v1417_v12 = vld [vmem:[#allocation2 + $0x1f8] sm:$0xff]  ;;  %v1456_v15 = vadd.f32 %v2969_v20, %v1385_v11  ;;  %v2204_v17 = vpack.c.bf16 %v1519_v13, %v1519_v13 }
 0x18a   : > { %v1488_v16 = vadd.f32 %v2969_v20, %v1417_v12  ;;  %v2236_v18 = vpack.c.bf16 %v1551_v14, %v1551_v14 }
 0x18b   : > { %v1520_v19 = vmax.f32 %v1456_v15, 0.0  ;;  %1840 = vst.msk [vmem:[%s2764_s22 + $0x78] sm:$0xf] %vm1809_vm4, %v2204_v17 }
 0x18c   : > { %v1552_v21 = vmax.f32 %v1488_v16, 0.0  ;;  %1872 = vst.msk [vmem:[%s2764_s22 + $0xf8] sm:$0xf] %vm1809_vm4, %v2236_v18 }
 0x18d   : > { %v2205_v22 = vpack.c.bf16 %v1520_v19, %v1520_v19 }
 0x18e   : > { %v2237_v23 = vpack.c.bf16 %v1552_v21, %v1552_v21 }
 0x18f   : > { %1841 = vst.msk [vmem:[%s2764_s22 + $0x7c] sm:$0xf] %vm1809_vm4, %v2205_v22 }
 0x190   : > { %1873 = vst.msk [vmem:[%s2764_s22 + $0xfc] sm:$0xf] %vm1809_vm4, %v2237_v23 }
 0x191 PF: > { %s13_s14 = sadd.s32 1, %s2414_s14   ;;  %s3028_s12 = smov %s2410_s13 }
 0x192   : > { %p10_p5 = scmp.ge.s32.totalorder %s13_s14, 6   ;;  %s3029_s13 = smov %s3031_s15 }
 0x194   :  { %12 = sbr.rel (!%p10_p5) target bundleno = 2 (0x2), region = 76 }

</bundles_post_ra>
